<compile_context>
chip_gen: v6e
topology: v6e:2x2x1
jax: 0.10.0
libtpu: 0.0.40
codegen_flags: <defaults>
</compile_context>

<pallas_src>
import functools
import math

import jax
import jax.numpy as jnp
from jax.experimental import pallas as pl
from jax.experimental.pallas import tpu as pltpu


# (T, H, d) -> (H, T, d): major-dim swap, the lane (minor) axis stays put.
if hasattr(pltpu, "einshape"):
    _swap01 = lambda x: pltpu.einshape("abc->bac", x)
else:  # fallback for older jax versions
    _swap01 = lambda x: jnp.swapaxes(x, 0, 1)


def mha_kernel(xq_ref, xk_ref, xv_ref,
               wq_ref, bq_ref, wk_ref, bk_ref,
               wv_ref, bv_ref, wo_ref, bo_ref,
               o_ref,
               k_scr, v_scr,
               *, num_heads, d_k, compute_dtype, precise):
    """One (batch, q-block) grid step.

    Ref shapes (batch dim squeezed away by the BlockSpecs):
      xq_ref: (Tq, D)      query rows of this q-block (already compute_dtype)
      xk_ref, xv_ref: (S, D)  full key/value rows for this batch element
      w*_ref: (D, D)       pre-transposed weights (W_q also pre-scaled)
      b*_ref: (1, D)       f32 biases (b_q pre-scaled)
      o_ref:  (Tq, D)
      k_scr, v_scr: (H, S, d_k) VMEM scratch — projected K/V, cached across
                    the q-block axis of the grid (recomputed at q-block 0).
    """
    cdt = compute_dtype

    # ---- K/V projections: once per batch element (q-block 0 only). ---------
    @pl.when(pl.program_id(1) == 0)
    def _project_kv():
        k = jnp.dot(xk_ref[...], wk_ref[...],
                    preferred_element_type=jnp.float32) + bk_ref[...]
        v = jnp.dot(xv_ref[...], wv_ref[...],
                    preferred_element_type=jnp.float32) + bv_ref[...]
        s_kv = k.shape[0]
        k_scr[...] = _swap01(k.astype(cdt).reshape(s_kv, num_heads, d_k))
        v_scr[...] = _swap01(v.astype(cdt).reshape(s_kv, num_heads, d_k))

    # ---- Q projection for this q-block (1/sqrt(d_k) folded into W_q/b_q). --
    q = jnp.dot(xq_ref[...], wq_ref[...],
                preferred_element_type=jnp.float32) + bq_ref[...]
    tq = q.shape[0]
    qh = _swap01(q.astype(cdt).reshape(tq, num_heads, d_k))      # (H, Tq, d_k)

    # ---- Scores + softmax: single live (H, Tq, S) f32 tensor. --------------
    s = jnp.einsum("hqd,hkd->hqk", qh, k_scr[...],
                   preferred_element_type=jnp.float32)           # (H, Tq, S)
    p = jnp.exp(s - jnp.max(s, axis=-1, keepdims=True))
    denom = jnp.sum(p, axis=-1, keepdims=True)
    if precise:
        p = p / denom
    else:
        p = p * pl.reciprocal(denom, approx=True)  # EUP slot, frees the VALU

    # ---- Context + output projection. ---------------------------------------
    ctx = jnp.einsum("hqk,hkd->hqd", p.astype(cdt), v_scr[...],
                     preferred_element_type=jnp.float32)         # (H, Tq, d_k)
    ctx = _swap01(ctx).reshape(tq, num_heads * d_k)              # (Tq, D)
    out = jnp.dot(ctx.astype(cdt), wo_ref[...],
                  preferred_element_type=jnp.float32) + bo_ref[...]
    o_ref[...] = out.astype(o_ref.dtype)


def _tpu_defaults():
    """Per-generation (block_q, vmem_limit_bytes) defaults."""
    kind = ""
    try:
        kind = jax.devices()[0].device_kind.lower()
    except Exception:
        pass
    if "v5 lite" in kind or "v5e" in kind or "v5lite" in kind:
        block_q, vmem = 128, 100 * 1024 * 1024   # v5e: 4x128^2 MXU, 128 MiB VMEM
    elif "v7" in kind:
        block_q, vmem = 256, 48 * 1024 * 1024    # v7x: 256-wide MXU, 64 MiB VMEM
    elif "v6" in kind:
        block_q, vmem = 256, 100 * 1024 * 1024   # v6e: 2x256^2 MXU, 128 MiB VMEM
    else:
        block_q, vmem = 128, 64 * 1024 * 1024    # conservative fallback
    try:  # never request more than ~75% of physical VMEM, if we can query it
        cap = pltpu.get_tpu_info().vmem_capacity_bytes
        vmem = min(vmem, int(cap * 0.75))
    except Exception:
        pass
    return block_q, vmem


def multi_head_attention(query, key, value, params, num_heads, *,
                         compute_dtype=jnp.float32, block_q=None,
                         vmem_limit_bytes=None):
    """Fused MHA forward.  query/key/value: (B, S, D).  params hold PyTorch-layout
    (out, in) weights and (D,) biases.  mask=None path only."""
    B, Sq, D = query.shape
    Skv = key.shape[1]
    assert value.shape == key.shape
    assert D % num_heads == 0
    d_k = D // num_heads

    default_bq, default_vmem = _tpu_defaults()
    if block_q is None:
        block_q = min(Sq, default_bq)
    if vmem_limit_bytes is None:
        vmem_limit_bytes = default_vmem
    assert Sq % block_q == 0, "Sq must be divisible by block_q"
    nq = Sq // block_q

    out_dtype = query.dtype
    scale = 1.0 / math.sqrt(d_k)
    cdt = jnp.dtype(compute_dtype)
    precise = cdt == jnp.dtype(jnp.float32)

    # One-time host-side weight prep:
    #   * transpose to (in, out) so the kernel never transposes a weight tile,
    #   * fold the 1/sqrt(d_k) attention scale into the Q projection,
    #   * optionally cast matmul operands to bf16 (f32 accumulation in-kernel).
    wqT = (params["wq"].T * scale).astype(cdt)
    wkT = params["wk"].T.astype(cdt)
    wvT = params["wv"].T.astype(cdt)
    woT = params["wo"].T.astype(cdt)
    bq = (params["bq"] * scale).reshape(1, D).astype(jnp.float32)
    bk = params["bk"].reshape(1, D).astype(jnp.float32)
    bv = params["bv"].reshape(1, D).astype(jnp.float32)
    bo = params["bo"].reshape(1, D).astype(jnp.float32)

    # Cast activations once on the host in the bf16 path: halves HBM->VMEM DMA
    # and removes per-step in-kernel casts over (S, D) tiles.
    xq = query.astype(cdt)
    xk = key.astype(cdt)
    xv = value.astype(cdt)

    # Batch dim squeezed out of the kernel refs; q-blocks form the inner grid
    # axis (marked "arbitrary" — it carries the cached K/V scratch).  Output
    # block stays lane-dense (Tq, D) with D a multiple of 128.
    xq_spec = pl.BlockSpec((pl.Squeezed(), block_q, D), lambda b, qi: (b, qi, 0))
    xkv_spec = pl.BlockSpec((pl.Squeezed(), Skv, D), lambda b, qi: (b, 0, 0))
    o_spec = pl.BlockSpec((pl.Squeezed(), block_q, D), lambda b, qi: (b, qi, 0))
    w_spec = pl.BlockSpec((D, D), lambda b, qi: (0, 0))
    b_spec = pl.BlockSpec((1, D), lambda b, qi: (0, 0))

    kernel = functools.partial(mha_kernel, num_heads=num_heads, d_k=d_k,
                               compute_dtype=cdt, precise=precise)

    # Advisory cost estimate so XLA overlaps surrounding ops with the kernel.
    itemsize = cdt.itemsize
    flops = (2 * B * (2 * Sq + 2 * Skv) * D * D      # Q, K, V, O projections
             + 4 * B * Sq * Skv * D)                 # scores + context matmuls
    bytes_accessed = (B * (Sq + 2 * Skv) * D * itemsize        # activations in
                      + 4 * D * D * itemsize + 4 * D * 4       # weights + biases
                      + B * Sq * D * jnp.dtype(out_dtype).itemsize)  # output
    cost = pl.CostEstimate(flops=int(flops),
                           transcendentals=int(B * num_heads * Sq * Skv),
                           bytes_accessed=int(bytes_accessed))

    return pl.pallas_call(
        kernel,
        out_shape=jax.ShapeDtypeStruct((B, Sq, D), out_dtype),
        grid_spec=pltpu.PrefetchScalarGridSpec(
            num_scalar_prefetch=0,
            grid=(B, nq),
            in_specs=[xq_spec, xkv_spec, xkv_spec,
                      w_spec, b_spec, w_spec, b_spec,
                      w_spec, b_spec, w_spec, b_spec],
            out_specs=o_spec,
            scratch_shapes=[pltpu.VMEM((num_heads, Skv, d_k), cdt),   # K cache
                            pltpu.VMEM((num_heads, Skv, d_k), cdt)],  # V cache
        ),
        compiler_params=pltpu.CompilerParams(
            dimension_semantics=("parallel", "arbitrary"),
            vmem_limit_bytes=vmem_limit_bytes),
        cost_estimate=cost,
    )(xq, xk, xv, wqT, bq, wkT, bk, wvT, bv, woT, bo)


def mha_reference(query, key, value, params, num_heads):
    """Pure-JAX reference mirroring the PyTorch module."""
    B, S, D = query.shape
    d_k = D // num_heads

    def linear(x, w, b):
        return jnp.einsum("bsd,ed->bse", x, w) + b

    Q = linear(query, params["wq"], params["bq"])
    K = linear(key, params["wk"], params["bk"])
    V = linear(value, params["wv"], params["bv"])

    def split(x):  # (B,S,D) -> (B,H,S,d_k)
        return x.reshape(B, S, num_heads, d_k).transpose(0, 2, 1, 3)

    Qh, Kh, Vh = split(Q), split(K), split(V)
    scores = jnp.einsum("bhqd,bhkd->bhqk", Qh, Kh) / math.sqrt(d_k)
    attn = jax.nn.softmax(scores, axis=-1)
    ctx = jnp.einsum("bhqk,bhkd->bhqd", attn, Vh)
    ctx = ctx.transpose(0, 2, 1, 3).reshape(B, S, D)
    return linear(ctx, params["wo"], params["bo"])


if __name__ == "__main__":
    B, S, D = 2, 16, 256
    num_heads = 2  # d_k = 128 -> lane-aligned head slices

    root = jax.random.PRNGKey(0)
    keys = jax.random.split(root, 11)
    bound = 1.0 / math.sqrt(D)  # nn.Linear default init range

    params = {
        "wq": jax.random.uniform(keys[0], (D, D), jnp.float32, -bound, bound),
        "bq": jax.random.uniform(keys[1], (D,), jnp.float32, -bound, bound),
        "wk": jax.random.uniform(keys[2], (D, D), jnp.float32, -bound, bound),
        "bk": jax.random.uniform(keys[3], (D,), jnp.float32, -bound, bound),
        "wv": jax.random.uniform(keys[4], (D, D), jnp.float32, -bound, bound),
        "bv": jax.random.uniform(keys[5], (D,), jnp.float32, -bound, bound),
        "wo": jax.random.uniform(keys[6], (D, D), jnp.float32, -bound, bound),
        "bo": jax.random.uniform(keys[7], (D,), jnp.float32, -bound, bound),
    }

    query = jax.random.normal(keys[8], (B, S, D), jnp.float32)
    key_in = jax.random.normal(keys[9], (B, S, D), jnp.float32)
    value = jax.random.normal(keys[10], (B, S, D), jnp.float32)

    ref = mha_reference(query, key_in, value, params, num_heads)

    # 1) Precise path: f32 MXU inputs, exact softmax normalization.
    out = jax.block_until_ready(
        multi_head_attention(query, key_in, value, params, num_heads))
    assert out.shape == (B, S, D)
    err = float(jnp.max(jnp.abs(out - ref)))
    assert jnp.allclose(out, ref, atol=1e-4, rtol=1e-4), f"f32 max abs err {err}"

    # 2) Fast path: bf16 activations/weights (f32 accumulation + f32 softmax)
    #    and EUP approx reciprocal for the softmax normalization.
    out_bf16 = jax.block_until_ready(
        multi_head_attention(query, key_in, value, params, num_heads,
                             compute_dtype=jnp.bfloat16))
    err_bf = float(jnp.max(jnp.abs(out_bf16 - ref)))
    assert jnp.allclose(out_bf16, ref, atol=5e-2, rtol=5e-2), \
        f"bf16 max abs err {err_bf}"

    # 3) Multi q-block path (exercises the once-per-batch K/V projection hoist
    #    across q-blocks of the grid).
    out_blk = jax.block_until_ready(
        multi_head_attention(query, key_in, value, params, num_heads,
                             block_q=8))
    err_blk = float(jnp.max(jnp.abs(out_blk - ref)))
    assert jnp.allclose(out_blk, ref, atol=1e-4, rtol=1e-4), \
        f"blocked f32 max abs err {err_blk}"

    print("KERNEL_OK")
</pallas_src>

<mosaic_0001>
module attributes {stable_mosaic.version = 11 : i64} {
  func.func @mha_kernel(%arg0: i32, %arg1: i32, %arg2: memref<1x16x256xf32, #tpu.memory_space<vmem>>, %arg3: memref<1x16x256xf32, #tpu.memory_space<vmem>>, %arg4: memref<1x16x256xf32, #tpu.memory_space<vmem>>, %arg5: memref<256x256xf32, #tpu.memory_space<vmem>>, %arg6: memref<1x256xf32, #tpu.memory_space<vmem>>, %arg7: memref<256x256xf32, #tpu.memory_space<vmem>>, %arg8: memref<1x256xf32, #tpu.memory_space<vmem>>, %arg9: memref<256x256xf32, #tpu.memory_space<vmem>>, %arg10: memref<1x256xf32, #tpu.memory_space<vmem>>, %arg11: memref<256x256xf32, #tpu.memory_space<vmem>>, %arg12: memref<1x256xf32, #tpu.memory_space<vmem>>, %arg13: memref<1x16x256xf32, #tpu.memory_space<vmem>>, %arg14: memref<2x16x128xf32, #tpu.memory_space<vmem>>, %arg15: memref<2x16x128xf32, #tpu.memory_space<vmem>>) attributes {dimension_semantics = [#tpu.dimension_semantics<parallel>, #tpu.dimension_semantics<arbitrary>], iteration_bounds = array<i64: 2, 1>, scalar_prefetch = 0 : i64, scratch_operands = 2 : i64, tpu.core_type = #tpu.core_type<tc>, window_params = [{transform_indices = @transform_0, window_bounds = array<i64: 1, 16, 256>}, {transform_indices = @transform_1, window_bounds = array<i64: 1, 16, 256>}, {transform_indices = @transform_2, window_bounds = array<i64: 1, 16, 256>}, {pipeline_mode = #tpu.pipeline_mode<synchronous>, transform_indices = @transform_3, window_bounds = array<i64: 256, 256>}, {pipeline_mode = #tpu.pipeline_mode<synchronous>, transform_indices = @transform_4, window_bounds = array<i64: 1, 256>}, {pipeline_mode = #tpu.pipeline_mode<synchronous>, transform_indices = @transform_5, window_bounds = array<i64: 256, 256>}, {pipeline_mode = #tpu.pipeline_mode<synchronous>, transform_indices = @transform_6, window_bounds = array<i64: 1, 256>}, {pipeline_mode = #tpu.pipeline_mode<synchronous>, transform_indices = @transform_7, window_bounds = array<i64: 256, 256>}, {pipeline_mode = #tpu.pipeline_mode<synchronous>, transform_indices = @transform_8, window_bounds = array<i64: 1, 256>}, {pipeline_mode = #tpu.pipeline_mode<synchronous>, transform_indices = @transform_9, window_bounds = array<i64: 256, 256>}, {pipeline_mode = #tpu.pipeline_mode<synchronous>, transform_indices = @transform_10, window_bounds = array<i64: 1, 256>}, {transform_indices = @transform_11, window_bounds = array<i64: 1, 16, 256>}]} {
    %c0_i32 = arith.constant 0 : i32
    %0 = arith.cmpi eq, %arg1, %c0_i32 : i32
    %1 = arith.extui %0 : i1 to i32
    %c0_i32_0 = arith.constant 0 : i32
    %2 = arith.cmpi ne, %1, %c0_i32_0 : i32
    scf.if %2 {
      %c0_25 = arith.constant 0 : index
      %c0_26 = arith.constant 0 : index
      %c0_27 = arith.constant 0 : index
      %35 = vector.load %arg3[%c0_25, %c0_26, %c0_27] : memref<1x16x256xf32, #tpu.memory_space<vmem>>, vector<1x16x256xf32>
      %36 = vector.shape_cast %35 : vector<1x16x256xf32> to vector<16x256xf32>
      %c0_28 = arith.constant 0 : index
      %c0_29 = arith.constant 0 : index
      %37 = vector.load %arg7[%c0_28, %c0_29] : memref<256x256xf32, #tpu.memory_space<vmem>>, vector<256x256xf32>
      %cst_30 = arith.constant dense<0.000000e+00> : vector<16x256xf32>
      %38 = tpu.matmul %36, %37, %cst_30 {dimension_numbers = #tpu.dot_dimension_numbers<[1], [0], [0], [1], [0, 0, 1, 1], [], []>} : vector<16x256xf32>, vector<256x256xf32>, vector<16x256xf32> -> vector<16x256xf32>
      %c0_31 = arith.constant 0 : index
      %c0_32 = arith.constant 0 : index
      %39 = vector.load %arg8[%c0_31, %c0_32] : memref<1x256xf32, #tpu.memory_space<vmem>>, vector<1x256xf32>
      %40 = vector.broadcast %39 : vector<1x256xf32> to vector<16x256xf32>
      %41 = arith.addf %38, %40 : vector<16x256xf32>
      %c0_33 = arith.constant 0 : index
      %c0_34 = arith.constant 0 : index
      %c0_35 = arith.constant 0 : index
      %42 = vector.load %arg4[%c0_33, %c0_34, %c0_35] : memref<1x16x256xf32, #tpu.memory_space<vmem>>, vector<1x16x256xf32>
      %43 = vector.shape_cast %42 : vector<1x16x256xf32> to vector<16x256xf32>
      %c0_36 = arith.constant 0 : index
      %c0_37 = arith.constant 0 : index
      %44 = vector.load %arg9[%c0_36, %c0_37] : memref<256x256xf32, #tpu.memory_space<vmem>>, vector<256x256xf32>
      %cst_38 = arith.constant dense<0.000000e+00> : vector<16x256xf32>
      %45 = tpu.matmul %43, %44, %cst_38 {dimension_numbers = #tpu.dot_dimension_numbers<[1], [0], [0], [1], [0, 0, 1, 1], [], []>} : vector<16x256xf32>, vector<256x256xf32>, vector<16x256xf32> -> vector<16x256xf32>
      %c0_39 = arith.constant 0 : index
      %c0_40 = arith.constant 0 : index
      %46 = vector.load %arg10[%c0_39, %c0_40] : memref<1x256xf32, #tpu.memory_space<vmem>>, vector<1x256xf32>
      %47 = vector.broadcast %46 : vector<1x256xf32> to vector<16x256xf32>
      %48 = arith.addf %45, %47 : vector<16x256xf32>
      %49 = vector.shape_cast %41 : vector<16x256xf32> to vector<16x2x128xf32>
      %50 = tpu.transpose %49, [1, 0, 2] : vector<16x2x128xf32> -> vector<2x16x128xf32>
      %c0_41 = arith.constant 0 : index
      %c0_42 = arith.constant 0 : index
      %c0_43 = arith.constant 0 : index
      %51 = vector.load %arg14[%c0_41, %c0_42, %c0_43] : memref<2x16x128xf32, #tpu.memory_space<vmem>>, vector<2x16x128xf32>
      tpu.vector_store %arg14[%c0_41, %c0_42, %c0_43], %50 {strides = array<i32>} : memref<2x16x128xf32, #tpu.memory_space<vmem>>, vector<2x16x128xf32>,
      %52 = vector.shape_cast %48 : vector<16x256xf32> to vector<16x2x128xf32>
      %53 = tpu.transpose %52, [1, 0, 2] : vector<16x2x128xf32> -> vector<2x16x128xf32>
      %c0_44 = arith.constant 0 : index
      %c0_45 = arith.constant 0 : index
      %c0_46 = arith.constant 0 : index
      %54 = vector.load %arg15[%c0_44, %c0_45, %c0_46] : memref<2x16x128xf32, #tpu.memory_space<vmem>>, vector<2x16x128xf32>
      tpu.vector_store %arg15[%c0_44, %c0_45, %c0_46], %53 {strides = array<i32>} : memref<2x16x128xf32, #tpu.memory_space<vmem>>, vector<2x16x128xf32>,
    } else {
    }
    %c0 = arith.constant 0 : index
    %c0_1 = arith.constant 0 : index
    %c0_2 = arith.constant 0 : index
    %3 = vector.load %arg2[%c0, %c0_1, %c0_2] : memref<1x16x256xf32, #tpu.memory_space<vmem>>, vector<1x16x256xf32>
    %4 = vector.shape_cast %3 : vector<1x16x256xf32> to vector<16x256xf32>
    %c0_3 = arith.constant 0 : index
    %c0_4 = arith.constant 0 : index
    %5 = vector.load %arg5[%c0_3, %c0_4] : memref<256x256xf32, #tpu.memory_space<vmem>>, vector<256x256xf32>
    %cst = arith.constant dense<0.000000e+00> : vector<16x256xf32>
    %6 = tpu.matmul %4, %5, %cst {dimension_numbers = #tpu.dot_dimension_numbers<[1], [0], [0], [1], [0, 0, 1, 1], [], []>} : vector<16x256xf32>, vector<256x256xf32>, vector<16x256xf32> -> vector<16x256xf32>
    %c0_5 = arith.constant 0 : index
    %c0_6 = arith.constant 0 : index
    %7 = vector.load %arg6[%c0_5, %c0_6] : memref<1x256xf32, #tpu.memory_space<vmem>>, vector<1x256xf32>
    %8 = vector.broadcast %7 : vector<1x256xf32> to vector<16x256xf32>
    %9 = arith.addf %6, %8 : vector<16x256xf32>
    %10 = vector.shape_cast %9 : vector<16x256xf32> to vector<16x2x128xf32>
    %11 = tpu.transpose %10, [1, 0, 2] : vector<16x2x128xf32> -> vector<2x16x128xf32>
    %c0_7 = arith.constant 0 : index
    %c0_8 = arith.constant 0 : index
    %c0_9 = arith.constant 0 : index
    %12 = vector.load %arg14[%c0_7, %c0_8, %c0_9] : memref<2x16x128xf32, #tpu.memory_space<vmem>>, vector<2x16x128xf32>
    "tpu.trace_start"() <{level = 10 : i32, message = "hqd,hkd->hqk"}> : () -> ()
    %cst_10 = arith.constant dense<0.000000e+00> : vector<2x16x16xf32>
    %13 = tpu.matmul %11, %12, %cst_10 {dimension_numbers = #tpu.dot_dimension_numbers<[2], [2], [1], [1], [0, 0, 0, 1, 1, 1], [0], [0]>} : vector<2x16x128xf32>, vector<2x16x128xf32>, vector<2x16x16xf32> -> vector<2x16x16xf32>
    "tpu.trace_stop"() : () -> ()
    %cst_11 = arith.constant dense<0xFF800000> : vector<2x16xf32>
    %14 = vector.multi_reduction <maximumf>, %13, %cst_11 [2] : vector<2x16x16xf32> to vector<2x16xf32>
    %15 = vector.shape_cast %14 : vector<2x16xf32> to vector<2x16x1xf32>
    %16 = vector.broadcast %15 : vector<2x16x1xf32> to vector<2x16x16xf32>
    %17 = arith.subf %13, %16 : vector<2x16x16xf32>
    %18 = math.exp %17 : vector<2x16x16xf32>
    %cst_12 = arith.constant dense<0.000000e+00> : vector<2x16xf32>
    %19 = vector.multi_reduction <add>, %18, %cst_12 [2] : vector<2x16x16xf32> to vector<2x16xf32>
    %20 = vector.shape_cast %19 : vector<2x16xf32> to vector<2x16x1xf32>
    %21 = vector.broadcast %20 : vector<2x16x1xf32> to vector<2x16x16xf32>
    %22 = arith.divf %18, %21 : vector<2x16x16xf32>
    %c0_13 = arith.constant 0 : index
    %c0_14 = arith.constant 0 : index
    %c0_15 = arith.constant 0 : index
    %23 = vector.load %arg15[%c0_13, %c0_14, %c0_15] : memref<2x16x128xf32, #tpu.memory_space<vmem>>, vector<2x16x128xf32>
    "tpu.trace_start"() <{level = 10 : i32, message = "hqk,hkd->hqd"}> : () -> ()
    %cst_16 = arith.constant dense<0.000000e+00> : vector<2x16x128xf32>
    %24 = tpu.matmul %22, %23, %cst_16 {dimension_numbers = #tpu.dot_dimension_numbers<[2], [1], [1], [2], [0, 0, 0, 1, 1, 2], [0], [0]>} : vector<2x16x16xf32>, vector<2x16x128xf32>, vector<2x16x128xf32> -> vector<2x16x128xf32>
    "tpu.trace_stop"() : () -> ()
    %25 = tpu.transpose %24, [1, 0, 2] : vector<2x16x128xf32> -> vector<16x2x128xf32>
    %26 = vector.shape_cast %25 : vector<16x2x128xf32> to vector<16x256xf32>
    %c0_17 = arith.constant 0 : index
    %c0_18 = arith.constant 0 : index
    %27 = vector.load %arg11[%c0_17, %c0_18] : memref<256x256xf32, #tpu.memory_space<vmem>>, vector<256x256xf32>
    %cst_19 = arith.constant dense<0.000000e+00> : vector<16x256xf32>
    %28 = tpu.matmul %26, %27, %cst_19 {dimension_numbers = #tpu.dot_dimension_numbers<[1], [0], [0], [1], [0, 0, 1, 1], [], []>} : vector<16x256xf32>, vector<256x256xf32>, vector<16x256xf32> -> vector<16x256xf32>
    %c0_20 = arith.constant 0 : index
    %c0_21 = arith.constant 0 : index
    %29 = vector.load %arg12[%c0_20, %c0_21] : memref<1x256xf32, #tpu.memory_space<vmem>>, vector<1x256xf32>
    %30 = vector.broadcast %29 : vector<1x256xf32> to vector<16x256xf32>
    %31 = arith.addf %28, %30 : vector<16x256xf32>
    %c0_22 = arith.constant 0 : index
    %c0_23 = arith.constant 0 : index
    %c0_24 = arith.constant 0 : index
    %32 = vector.load %arg13[%c0_22, %c0_23, %c0_24] : memref<1x16x256xf32, #tpu.memory_space<vmem>>, vector<1x16x256xf32>
    %33 = vector.shape_cast %32 : vector<1x16x256xf32> to vector<16x256xf32>
    %34 = vector.shape_cast %31 : vector<16x256xf32> to vector<1x16x256xf32>
    tpu.vector_store %arg13[%c0_22, %c0_23, %c0_24], %34 {strides = array<i32>} : memref<1x16x256xf32, #tpu.memory_space<vmem>>, vector<1x16x256xf32>,
    return
  }
  func.func @transform_0(%arg0: i32, %arg1: i32) -> (i32, i32, i32) {
    %c0_i32 = arith.constant 0 : i32
    %c0_i32_0 = arith.constant 0 : i32
    return %arg0, %arg1, %c0_i32 : i32, i32, i32
  }
  func.func @transform_1(%arg0: i32, %arg1: i32) -> (i32, i32, i32) {
    %c0_i32 = arith.constant 0 : i32
    %c0_i32_0 = arith.constant 0 : i32
    %c0_i32_1 = arith.constant 0 : i32
    return %arg0, %c0_i32, %c0_i32_0 : i32, i32, i32
  }
  func.func @transform_2(%arg0: i32, %arg1: i32) -> (i32, i32, i32) {
    %c0_i32 = arith.constant 0 : i32
    %c0_i32_0 = arith.constant 0 : i32
    %c0_i32_1 = arith.constant 0 : i32
    return %arg0, %c0_i32, %c0_i32_0 : i32, i32, i32
  }
  func.func @transform_3(%arg0: i32, %arg1: i32) -> (i32, i32) {
    %c0_i32 = arith.constant 0 : i32
    %c0_i32_0 = arith.constant 0 : i32
    %c0_i32_1 = arith.constant 0 : i32
    return %c0_i32, %c0_i32_0 : i32, i32
  }
  func.func @transform_4(%arg0: i32, %arg1: i32) -> (i32, i32) {
    %c0_i32 = arith.constant 0 : i32
    %c0_i32_0 = arith.constant 0 : i32
    %c0_i32_1 = arith.constant 0 : i32
    return %c0_i32, %c0_i32_0 : i32, i32
  }
  func.func @transform_5(%arg0: i32, %arg1: i32) -> (i32, i32) {
    %c0_i32 = arith.constant 0 : i32
    %c0_i32_0 = arith.constant 0 : i32
    %c0_i32_1 = arith.constant 0 : i32
    return %c0_i32, %c0_i32_0 : i32, i32
  }
  func.func @transform_6(%arg0: i32, %arg1: i32) -> (i32, i32) {
    %c0_i32 = arith.constant 0 : i32
    %c0_i32_0 = arith.constant 0 : i32
    %c0_i32_1 = arith.constant 0 : i32
    return %c0_i32, %c0_i32_0 : i32, i32
  }
  func.func @transform_7(%arg0: i32, %arg1: i32) -> (i32, i32) {
    %c0_i32 = arith.constant 0 : i32
    %c0_i32_0 = arith.constant 0 : i32
    %c0_i32_1 = arith.constant 0 : i32
    return %c0_i32, %c0_i32_0 : i32, i32
  }
  func.func @transform_8(%arg0: i32, %arg1: i32) -> (i32, i32) {
    %c0_i32 = arith.constant 0 : i32
    %c0_i32_0 = arith.constant 0 : i32
    %c0_i32_1 = arith.constant 0 : i32
    return %c0_i32, %c0_i32_0 : i32, i32
  }
  func.func @transform_9(%arg0: i32, %arg1: i32) -> (i32, i32) {
    %c0_i32 = arith.constant 0 : i32
    %c0_i32_0 = arith.constant 0 : i32
    %c0_i32_1 = arith.constant 0 : i32
    return %c0_i32, %c0_i32_0 : i32, i32
  }
  func.func @transform_10(%arg0: i32, %arg1: i32) -> (i32, i32) {
    %c0_i32 = arith.constant 0 : i32
    %c0_i32_0 = arith.constant 0 : i32
    %c0_i32_1 = arith.constant 0 : i32
    return %c0_i32, %c0_i32_0 : i32, i32
  }
  func.func @transform_11(%arg0: i32, %arg1: i32) -> (i32, i32, i32) {
    %c0_i32 = arith.constant 0 : i32
    %c0_i32_0 = arith.constant 0 : i32
    return %arg0, %arg1, %c0_i32 : i32, i32, i32
  }
}

</mosaic_0001>

<bundles_post_ra>
// kernel: tpu_custom_call.1
= control target key start
LH: loop header
LB: loop body
LE: loop exit
PB: predicated region body
PF: predicated region fallthrough
CT: control target
= control target key end

     0   :  { %s3746_s0 = inlined_call_operand.hbm [shape: f32[2,16,256], index: 0, kind: input, shape index: {}]   ;;  %s3747_s1 = inlined_call_operand.hbm [shape: f32[2,16,256], index: 1, kind: input, shape index: {}]   ;;  %s3748_s2 = inlined_call_operand.hbm [shape: f32[2,16,256], index: 2, kind: input, shape index: {}]   ;;  %s3749_s3 = inlined_call_operand.hbm [shape: f32[256,256], index: 3, kind: input, shape index: {}]   ;;  %s3750_s4 = inlined_call_operand.vmem [shape: f32[1,256], index: 4, kind: input, shape index: {}]   ;;  %s3751_s5 = inlined_call_operand.hbm [shape: f32[256,256], index: 5, kind: input, shape index: {}]   ;;  %s3752_s6 = inlined_call_operand.vmem [shape: f32[1,256], index: 6, kind: input, shape index: {}]   ;;  %s3753_s7 = inlined_call_operand.hbm [shape: f32[256,256], index: 7, kind: input, shape index: {}]   ;;  %s3754_s8 = inlined_call_operand.vmem [shape: f32[1,256], index: 8, kind: input, shape index: {}]   ;;  %s3755_s9 = inlined_call_operand.hbm [shape: f32[256,256], index: 9, kind: input, shape index: {}]   ;;  %s3756_s10 = inlined_call_operand.vmem [shape: f32[1,256], index: 10, kind: input, shape index: {}]   ;;  %s3757_s11 = inlined_call_operand.hbm [shape: f32[2,16,256], index: 11, kind: output, shape index: {}]  }
   0x1   :  { %3775 = sst [smem:[#allocation29_spill]] %s3747_s1 }
   0x2   :  { %3776 = sst [smem:[#allocation30_spill]] %s3749_s3 }
   0x3   :  { %3777 = sst [smem:[#allocation31_spill]] %s3751_s5 }
   0x4   :  { %3778 = sst [smem:[#allocation32_spill]] %s3753_s7 }
   0x5   :  { %3779 = sst [smem:[#allocation33_spill]] %s3756_s10 }
   0x6   :  { %3780 = sst [smem:[#allocation34_spill]] %s3757_s11 }
   0x7   :  { %16 = vsyncpa [#allocation5], 0 }
   0x8   :  { %18 = vsyncpa [#allocation5 + $0x1], 0 }
   0x9   :  { %19 = vsyncpa [#allocation8], 0 }
   0xa   :  { %21 = vsyncpa [#allocation8 + $0x1], 0 }
   0xb   :  { %22 = vsyncpa [#allocation11], 0 }
   0xc   :  { %23 = vsyncpa [#allocation14], 0 }
   0xd   :  { %24 = vsyncpa [#allocation6], 0 }
   0xe   :  { %26 = vsyncpa [#allocation6 + $0x1], 0  ;;  %s3271_s17 = smov 0   ;;  %s3273_s18 = smov 0  }
   0xf   :  { %s3275_s19 = smov 0   ;;  %s3277_s20 = smov 0  }
  0x10   :  { %s3279_s21 = smov 0   ;;  %s3281_s22 = smov 0  }
  0x11 LB: > { %3781 = sst [smem:[#allocation22_spill]] %s3174_s17  ;;  %s3302_s23 = sadd.s32 4294967295, %s3194_s22   ;;  %s3194_s22 = sphi %s3281_s22, %s32_s22   ;;  %s3190_s21 = sphi %s3279_s21, %s3819_s21   ;;  %s3186_s20 = sphi %s3277_s20, %s3818_s20   ;;  %s3182_s19 = sphi %s3275_s19, %s3822_s19   ;;  %s3178_s18 = sphi %s3273_s18, %s3821_s18   ;;  %s3174_s17 = sphi %s3271_s17, %s3820_s17  }
  0x12   : > { %3782 = sst [smem:[#allocation23_spill]] %s3190_s21  ;;  %s2680_s24 = sadd.s32 4294967294, %s3194_s22  }
  0x13   : > { %3783 = sst [smem:[#allocation24_spill]] %s3194_s22  ;;  %p66_p0 = scmp.ne.s32.totalorder %s3178_s18, %s3174_s17 }
  0x14   : > { %p3759_p1 = scmp.eq.s32.totalorder %s3302_s23, 0  ;;  %p312_p2 = scmp.eq.s32.totalorder %s3302_s23, 1 }
  0x15   : > { %p318_p3 = scmp.eq.s32.totalorder %s2680_s24, 1  ;;  %p2681_p5 = scmp.ge.s32.totalorder %s3194_s22, 1 }
  0x16   : > { %p3311_p4 = por %p3759_p1, %p66_p0  ;;  %p325_p7 = scmp.lt.s32.totalorder %s3194_s22, 3 }
  0x17   : > { %p3316_p6 = por %p318_p3, %p66_p0  ;;  %s3196_s28 = smov [#allocation10]  }
  0x18   : > { %p3321_p8 = pnand %p2681_p5, %p325_p7  ;;  %s337_s29 = sshll.u32 %s3196_s28, 4  ;;  %s338_s29 = int_to_ptr.vmem [resolvable:$true] %s337_s29 }
  0x19   : > { %s3785_s26 = scalar_select %p3316_p6, 1, 0 }
  0x1a   : > { %p2802_p9 = pneg %p3321_p8  ;;  %s3197_s12 = smov [#allocation13]  }
  0x1b   : > { %3786 = sst [smem:[#allocation25_spill]] %s3785_s26  ;;  %s369_s13 = sshll.u32 %s3197_s12, 4  ;;  %s370_s13 = int_to_ptr.vmem [resolvable:$true] %s369_s13 }
  0x1c   : > { %p3330_p11 = pnand %p2802_p9, %p3759_p1  ;;  %s2925_s14 = scalar_lea.vmem %s338_s29, 8192 }
  0x1d   : > { %p2926_p13 = scmp.ne.s32.totalorder %s338_s29, %s2925_s14  ;;  %p2933_p5 = scmp.lt.s32.totalorder %s338_s29, %s338_s29 }
  0x1e   : > { %p3771_p12 = pneg %p3330_p11  ;;  %p2934_p7 = scmp.lt.s32.totalorder %s2925_s14, %s2925_s14 }
  0x20   : > { %p2928_p0 = pnand %p2926_p13, %p3771_p12  ;;  %p2935_p10 = por %p2934_p7, %p2933_p5 }
  0x22   : > { %p2929_p3 = pneg %p2928_p0 }
  0x24   : > { %p2936_p9 = pnand %p2935_p10, %p2929_p3 }
  0x26   : > { %2939 = shalt.err (!%p2936_p9)
}
  0x27   : > { %s3760_s15 = smov 256   ;;  %s3762_s16 = smov 16  }
  0x28   : > { %s3789_s3 = sld [smem:[#allocation30_spill]]  ;;  %s2951_s12 = scalar_lea.vmem %s370_s13, 8192 }
  0x29   : > { %p2952_p13 = scmp.ne.s32.totalorder %s370_s13, %s2951_s12  ;;  %p2959_p10 = scmp.lt.s32.totalorder %s370_s13, %s370_s13 }
  0x2a   : > { %p2960_p3 = scmp.lt.s32.totalorder %s2951_s12, %s2951_s12 }
  0x2b   : > { %p2954_p0 = pnand %p2952_p13, %p3771_p12 }
  0x2c   : > { %p2961_p7 = por %p2960_p3, %p2959_p10 }
  0x2d   : > { %p2955_p5 = pneg %p2954_p0 }
  0x2e   : > { %2805 = dma.hbm_to_vmem [thread:$0]  (!%p3330_p11), %s3789_s3, 8192, %s338_s29, [#allocation11], %s3760_s15, %s3760_s15, %s3762_s16  }
  0x2f   : > { %p2962_p9 = pnand %p2961_p7, %p2955_p5 }
  0x31   : > { %2965 = shalt.err (!%p2962_p9)
}
  0x32   : > { %s3790_s7 = sld [smem:[#allocation32_spill]]  ;;  %s44_s29 = sadd.s32 1, %s3190_s21 }
  0x33   : > { %s53_s24 = sadd.s32 1, %s3182_s19  ;;  %p46_p13 = scmp.ge.s32.totalorder %s44_s29, 2 }
  0x34   : > { %p60_p0 = scmp.ne.s32.totalorder %s3182_s19, %s3178_s18  ;;  %p61_p5 = scmp.eq.s32.totalorder %s3194_s22, 0 }
  0x35   : > { %p2833_p10 = scmp.lt.s32.totalorder %s3194_s22, 2  ;;  %s3824_s29 = smov (%p46_p13, %s44_s29), 0 }
  0x36   : > { %3791 = sst [smem:[#allocation26_spill]] %s3824_s29  ;;  %p62_p3 = por %p61_p5, %p60_p0 }
  0x37   : > { %p3368_p7 = por %p312_p2, %p60_p0  ;;  %s48_s28 = ssub.s32 %s3190_s21, %s3824_s29 }
  0x38   : > { %2811 = dma.hbm_to_vmem [thread:$0]  (!%p3330_p11), %s3790_s7, 8192, %s370_s13, [#allocation14], %s3760_s15, %s3760_s15, %s3762_s16  }
  0x39   : > { %s3792_s26 = scalar_select %p3368_p7, 1, 0 }
  0x3a   : > { %s3766_s12 = sand.u32 1, %s3182_s19   ;;  %p51_p9 = scmp.eq.s32.totalorder %s48_s28, 0 }
  0x3b   : > { %3793 = sst [smem:[#allocation27_spill]] %s3792_s26  ;;  %s3377_s13 = sshll.u32 %s3766_s12, 5 }
  0x3c   : > { %s3380_s14 = sshll.u32 %s3190_s21, 9  ;;  %p3382_p1 = pnand %p2833_p10, %p62_p3 }
  0x3d   : > { %s3387_s16 = scalar_select %p51_p9, %s3182_s19, %s53_s24  }
  0x3e   : > { %s426_s3 = sand.u32 1, %s3194_s22   ;;  %s3796_s1 = sld [smem:[#allocation29_spill]] }
  0x3f   : > { %3795 = sst [smem:[#allocation28_spill]] %s3387_s16  ;;  %s430_s17 = scalar_lea.vmem [#allocation7], %s3377_s13 }
  0x40   : > { %s437_s12 = sshll.u32 %s430_s17, 4  ;;  %s3395_s11 = scalar_lea.sflag [#allocation8], %s426_s3  ;;  %s438_s12 = int_to_ptr.vmem [resolvable:$true] %s437_s12 }
  0x41   : > { %p3774_p2 = pneg %p3382_p1  ;;  %s2979_s21 = scalar_lea.vmem %s438_s12, 512 }
  0x42   : > { %p2980_p13 = scmp.ne.s32.totalorder %s438_s12, %s2979_s21  ;;  %s3200_s24 = smov [#allocation7]  }
  0x43   : > { %s2984_s16 = sshll.u32 %s3200_s24, 4  ;;  %s2985_s16 = int_to_ptr.vmem [resolvable:$false] %s2984_s16 }
  0x44   : > { %s436_s28 = scalar_lea.hbm %s3796_s1, %s3380_s14  ;;  %p2982_p0 = pnand %p2980_p13, %p3774_p2 }
  0x45   : > { %s2986_s22 = scalar_lea.vmem %s2985_s16, 1024  ;;  %p2987_p10 = scmp.lt.s32.totalorder %s438_s12, %s2985_s16 }
  0x46   : > { %p2983_p5 = pneg %p2982_p0  ;;  %p2988_p3 = scmp.lt.s32.totalorder %s2986_s22, %s2979_s21 }
  0x48   : > { %p2989_p9 = por %p2988_p3, %p2987_p10 }
  0x4a   : > { %p2990_p12 = pnand %p2989_p9, %p2983_p5 }
  0x4c   : > { %2993 = shalt.err (!%p2990_p12)
}
  0x4d   : > { %s3797_s3 = smov 16   ;;  %s3798_s7 = smov 256  }
  0x4e   : > { %2821 = dma.hbm_to_vmem [thread:$0]  (!%p3382_p1), %s436_s28, 512, %s438_s12, %s3395_s11, %s3798_s7, %s3798_s7, %s3797_s3  }
  0x4f   : > { %s3201_s17 = smov [#allocation12]   ;;  %s3202_s1 = smov [#allocation15]  }
  0x50   : > { %s353_s29 = sshll.u32 %s3201_s17, 4  ;;  %s385_s24 = sshll.u32 %s3202_s1, 4  ;;  %s354_s29 = int_to_ptr.vmem [resolvable:$true] %s353_s29  ;;  %s386_s24 = int_to_ptr.vmem [resolvable:$true] %s385_s24 }
  0x51   : > { %s3005_s26 = scalar_lea.vmem %s354_s29, 8192  ;;  %p3799_p0 = pneg %p3330_p11 }
  0x52   : > { %p3006_p13 = scmp.ne.s32.totalorder %s354_s29, %s3005_s26  ;;  %p3013_p12 = scmp.lt.s32.totalorder %s354_s29, %s354_s29 }
  0x53   : > { %p3014_p3 = scmp.lt.s32.totalorder %s3005_s26, %s3005_s26 }
  0x54   : > { %p3008_p10 = pnand %p3006_p13, %p3799_p0 }
  0x55   : > { %p3015_p9 = por %p3014_p3, %p3013_p12 }
  0x56   : > { %p3009_p5 = pneg %p3008_p10 }
  0x58   : > { %p3016_p2 = pnand %p3015_p9, %p3009_p5 }
  0x5a   : > { %3019 = shalt.err (!%p3016_p2)
}
  0x5b   : > { %s3800_s5 = sld [smem:[#allocation31_spill]]  ;;  %s3031_s1 = scalar_lea.vmem %s386_s24, 8192 }
  0x5c   : > { %p3032_p6 = scmp.ne.s32.totalorder %s386_s24, %s3031_s1  ;;  %p3801_p13 = pmov %p3799_p0 }
  0x5d   : > { %p3039_p12 = scmp.lt.s32.totalorder %s386_s24, %s386_s24  ;;  %p3040_p5 = scmp.lt.s32.totalorder %s3031_s1, %s3031_s1 }
  0x5e   : > { %p3034_p0 = pnand %p3032_p6, %p3801_p13 }
  0x5f   : > { %p3041_p2 = por %p3040_p5, %p3039_p12 }
  0x60   : > { %p3035_p10 = pneg %p3034_p0 }
  0x61   : > { %2808 = dma.hbm_to_vmem [thread:$0]  (!%p3330_p11), %s3800_s5, 8192, %s354_s29, [#allocation11], %s3798_s7, %s3798_s7, %s3797_s3  }
  0x62   : > { %p3042_p3 = pnand %p3041_p2, %p3035_p10 }
  0x64   : > { %3045 = shalt.err (!%p3042_p3)
}
  0x65   : > { %2814 = dma.hbm_to_vmem [thread:$0]  (!%p3330_p11), %s3755_s9, 8192, %s386_s24, [#allocation14], %s3798_s7, %s3798_s7, %s3797_s3  }
  0x66   : > { %s415_s17 = scalar_lea.hbm %s3746_s0, %s3380_s14  ;;  %s406_s29 = scalar_lea.vmem [#allocation4], %s3377_s13 }
  0x67   : > { %s416_s21 = sshll.u32 %s406_s29, 4  ;;  %s457_s1 = scalar_lea.hbm %s3748_s2, %s3380_s14  ;;  %s417_s21 = int_to_ptr.vmem [resolvable:$true] %s416_s21 }
  0x68   : > { %s3802_s5 = sand.u32 1, %s3182_s19   ;;  %s3059_s16 = scalar_lea.vmem %s417_s21, 512 }
  0x69   : > { %s403_s10 = scalar_lea.sflag [#allocation5], %s3802_s5  ;;  %p3060_p6 = scmp.ne.s32.totalorder %s417_s21, %s3059_s16 }
  0x6a   : > { %p3803_p9 = pneg %p3382_p1  ;;  %s3203_s24 = smov [#allocation4]  }
  0x6b   : > { %s3064_s26 = sshll.u32 %s3203_s24, 4  ;;  %s3065_s26 = int_to_ptr.vmem [resolvable:$false] %s3064_s26 }
  0x6c   : > { %p3062_p13 = pnand %p3060_p6, %p3803_p9  ;;  %s3066_s12 = scalar_lea.vmem %s3065_s26, 1024 }
  0x6d   : > { %p3067_p11 = scmp.lt.s32.totalorder %s417_s21, %s3065_s26  ;;  %p3068_p10 = scmp.lt.s32.totalorder %s3066_s12, %s3059_s16 }
  0x6e   : > { %p3063_p0 = pneg %p3062_p13 }
  0x6f   : > { %p3069_p12 = por %p3068_p10, %p3067_p11 }
  0x71   : > { %p3070_p5 = pnand %p3069_p12, %p3063_p0 }
  0x73   : > { %3073 = shalt.err (!%p3070_p5)
}
  0x74   : > { %2818 = dma.hbm_to_vmem [thread:$0]  (!%p3382_p1), %s415_s17, 512, %s417_s21, %s403_s10, %s3798_s7, %s3798_s7, %s3797_s3  }
  0x75   : > { %s451_s5 = scalar_lea.vmem [#allocation9], %s3377_s13  ;;  %p3804_p3 = pmov %p3803_p9 }
  0x76   : > { %s458_s28 = sshll.u32 %s451_s5, 4  ;;  %s3204_s30 = smov [#allocation9]   ;;  %s459_s28 = int_to_ptr.vmem [resolvable:$true] %s458_s28 }
  0x77   : > { %s3087_s29 = scalar_lea.vmem %s459_s28, 512  ;;  %s3092_s22 = sshll.u32 %s3204_s30, 4  ;;  %s3093_s22 = int_to_ptr.vmem [resolvable:$false] %s3092_s22 }
  0x78   : > { %p3088_p2 = scmp.ne.s32.totalorder %s459_s28, %s3087_s29  ;;  %s3094_s16 = scalar_lea.vmem %s3093_s22, 1024 }
  0x79   : > { %p3095_p13 = scmp.lt.s32.totalorder %s459_s28, %s3093_s22  ;;  %p3096_p0 = scmp.lt.s32.totalorder %s3094_s16, %s3087_s29 }
  0x7a   : > { %p3090_p6 = pnand %p3088_p2, %p3804_p3 }
  0x7b   : > { %p3097_p11 = por %p3096_p0, %p3095_p13 }
  0x7c   : > { %p3091_p9 = pneg %p3090_p6 }
  0x7e   : > { %p3098_p10 = pnand %p3097_p11, %p3091_p9 }
  0x80   : > { %3101 = shalt.err (!%p3098_p10)
}
  0x81   : > { %2824 = dma.hbm_to_vmem [thread:$0]  (!%p3382_p1), %s457_s1, 512, %s459_s28, %s3395_s11, %s3798_s7, %s3798_s7, %s3797_s3  }
  0x82   : > { %470 = sbr.rel (%p3321_p8) target bundleno = 1443 (0x5a3), region = 64  ;;  %s3467_s17 = sand.u32 (!%p3321_p8), 1, %s3178_s18  }
  0x83   : > { %s3470_s15 = sshll.u32 (!%p3321_p8), %s3467_s17, 5  ;;  %s473_s21 = scalar_lea.sflag (!%p3321_p8), [#allocation5], %s3467_s17 }
  0x84   : > { %s3474_s24 = scalar_lea.vmem (!%p3321_p8), [#allocation4], %s3470_s15 }
  0x87   : > { %3153 = dma.done.wait (%p3311_p4), %s473_s21, 512  }
  0x88   : > { %3155 = vsyncadd (%p3311_p4), %s473_s21, 4294966784  ;;  %s481_s11 = sand.u32 1, %s3302_s23   ;;  %s3482_s14 = scalar_lea.vmem [#allocation7], %s3470_s15 }
  0x89   : > { %s482_s27 = scalar_lea.sflag [#allocation8], %s481_s11 }
  0x8a   : > { %3157 = dma.done.wait (%p3311_p4), %s482_s27, 1024  }
  0x8b   : > { %3159 = vsyncadd (%p3311_p4), %s482_s27, 4294966272  ;;  %s3489_s3 = scalar_lea.vmem [#allocation9], %s3470_s15  ;;  %p3805_p1 = scmp.eq.s32.totalorder %s3302_s23, 0 }
  0x8d   : > { %3161 = dma.done.wait (%p3805_p1), [#allocation11], 16384   ;;  %p3806_p8 = pmov %p3805_p1 }
  0x8e   : > { %p3807_p12 = pmov %p3805_p1 }
  0x8f   : > { %3163 = vsyncadd (%p3806_p8), [#allocation11], 4294950912 }
  0x90   : > { %3165 = dma.done.wait (%p3807_p12), [#allocation14], 16384   ;;  %p3808_p5 = pmov %p3805_p1 }
  0x91   : > { %v600_v0 = vld [vmem:[#allocation12 + $0xf8] sm:$0xff]  ;;  %v599_v1 = vld [vmem:[#allocation12 + $0xf0] sm:$0xff]  ;;  %v598_v2 = vld [vmem:[#allocation12 + $0xe8] sm:$0xff]  ;;  %vm1894_vm0 = vcmask 130048   ;;  %s3809_s29 = sld [smem:[#allocation33_spill]]  ;;  %s558_s30 = scalar_lea.vmem [#allocation16], %s3470_s15 }
  0x92   : > { %3167 = vsyncadd (%p3808_p5), [#allocation14], 4294950912  ;;  %645 = vmatprep.subr.mxu0 %v600_v0  ;;  %v597_v3 = vld [vmem:[#allocation12 + $0xe0] sm:$0xff]  ;;  %v596_v4 = vld [vmem:[#allocation12 + $0xd8] sm:$0xff]  ;;  %s2511_s22 = sshll.u32 %s558_s30, 4  ;;  %s2733_s10 = sshll.u32 %s3186_s20, 9  ;;  %s3693_s22 = int_to_ptr.vmem [resolvable:$true] %s2511_s22 }
  0x93   : > { %646 = vmatpush1.msra.mxu0 %v599_v1  ;;  %v595_v5 = vld [vmem:[#allocation12 + $0xd0] sm:$0xff]  ;;  %v594_v6 = vld [vmem:[#allocation12 + $0xc8] sm:$0xff]  ;;  %v593_v7 = vld [vmem:[#allocation12 + $0xc0] sm:$0xff]  ;;  %s2495_s15 = scalar_lea.sflag [#allocation6], %s3467_s17  ;;  %s3102_s27 = scalar_lea.vmem %s3693_s22, 512 }
  0x94   : > { %647 = vmatprep.subr.mxu0 %v598_v2  ;;  %v592_v8 = vld [vmem:[#allocation12 + $0xb8] sm:$0xff]  ;;  %v591_v9 = vld [vmem:[#allocation12 + $0xb0] sm:$0xff]  ;;  %v590_v10 = vld [vmem:[#allocation12 + $0xa8] sm:$0xff]  ;;  %p3103_p4 = scmp.ne.s32.totalorder %s3693_s22, %s3102_s27  ;;  %s3208_s20 = smov [#allocation16]  }
  0x95   : > { %648 = vmatpush1.msra.mxu0 %v597_v3  ;;  %v589_v11 = vld [vmem:[#allocation12 + $0xa0] sm:$0xff]  ;;  %v588_v12 = vld [vmem:[#allocation12 + $0x98] sm:$0xff]  ;;  %v587_v13 = vld [vmem:[#allocation12 + $0x90] sm:$0xff] }
  0x96   : > { %649 = vmatprep.subr.mxu0 %v596_v4  ;;  %v586_v14 = vld [vmem:[#allocation12 + $0x88] sm:$0xff]  ;;  %v585_v15 = vld [vmem:[#allocation12 + $0x80] sm:$0xff]  ;;  %v584_v16 = vld [vmem:[#allocation12 + $0x78] sm:$0xff]  ;;  %p3104_p2 = pnand %p3103_p4, %p3368_p7 }
  0x97   : > { %650 = vmatpush1.msra.mxu0 %v595_v5  ;;  %v583_v17 = vld [vmem:[#allocation12 + $0x70] sm:$0xff]  ;;  %v582_v18 = vld [vmem:[#allocation12 + $0x68] sm:$0xff]  ;;  %v581_v19 = vld [vmem:[#allocation12 + $0x60] sm:$0xff] }
  0x98   : > { %651 = vmatprep.subr.mxu0 %v594_v6  ;;  %v580_v20 = vld [vmem:[#allocation12 + $0x58] sm:$0xff]  ;;  %v579_v21 = vld [vmem:[#allocation12 + $0x50] sm:$0xff]  ;;  %v578_v22 = vld [vmem:[#allocation12 + $0x48] sm:$0xff]  ;;  %p3105_p3 = pneg %p3104_p2 }
  0x99   : > { %652 = vmatpush1.msra.mxu0 %v593_v7  ;;  %v577_v23 = vld [vmem:[#allocation12 + $0x40] sm:$0xff]  ;;  %v566_v24 = vld [vmem:[%s3482_s14 + $0x8] sm:$0xff]  ;;  %v576_v25 = vld [vmem:[#allocation12 + $0x38] sm:$0xff] }
  0x9a   : > { %653 = vmatprep.subr.mxu0 %v592_v8  ;;  %709 = vmatprep.mubr.f32.mxu0 %v566_v24  ;;  %v575_v26 = vld [vmem:[#allocation12 + $0x30] sm:$0xff]  ;;  %v574_v27 = vld [vmem:[#allocation12 + $0x28] sm:$0xff]  ;;  %v573_v28 = vld [vmem:[#allocation12 + $0x20] sm:$0xff] }
  0x9b   : > { %654 = vmatpush1.msra.mxu0 %v591_v9  ;;  %v572_v29 = vld [vmem:[#allocation12 + $0x18] sm:$0xff]  ;;  %v571_v30 = vld [vmem:[#allocation12 + $0x10] sm:$0xff]  ;;  %v570_v31 = vld [vmem:[#allocation12 + $0x8] sm:$0xff] }
  0x9c   : > { %655 = vmatprep.subr.mxu0 %v590_v10  ;;  %v569_v32 = vld [vmem:[#allocation12] sm:$0xff]  ;;  %v632_v33 = vld [vmem:[#allocation12 + $0x1f8] sm:$0xff]  ;;  %v631_v34 = vld [vmem:[#allocation12 + $0x1f0] sm:$0xff] }
  0x9d   : > { %656 = vmatpush1.msra.mxu0 %v589_v11  ;;  %v630_v35 = vld [vmem:[#allocation12 + $0x1e8] sm:$0xff]  ;;  %v629_v36 = vld [vmem:[#allocation12 + $0x1e0] sm:$0xff]  ;;  %v628_v37 = vld [vmem:[#allocation12 + $0x1d8] sm:$0xff] }
  0x9e   : > { %657 = vmatprep.subr.mxu0 %v588_v12  ;;  %v627_v38 = vld [vmem:[#allocation12 + $0x1d0] sm:$0xff]  ;;  %v626_v39 = vld [vmem:[#allocation12 + $0x1c8] sm:$0xff]  ;;  %v625_v40 = vld [vmem:[#allocation12 + $0x1c0] sm:$0xff] }
  0x9f   : > { %658 = vmatpush1.msra.mxu0 %v587_v13  ;;  %v624_v41 = vld [vmem:[#allocation12 + $0x1b8] sm:$0xff]  ;;  %v623_v42 = vld [vmem:[#allocation12 + $0x1b0] sm:$0xff]  ;;  %v622_v43 = vld [vmem:[#allocation12 + $0x1a8] sm:$0xff] }
  0xa0   : > { %659 = vmatprep.subr.mxu0 %v586_v14  ;;  %v621_v44 = vld [vmem:[#allocation12 + $0x1a0] sm:$0xff]  ;;  %v620_v45 = vld [vmem:[#allocation12 + $0x198] sm:$0xff]  ;;  %v619_v46 = vld [vmem:[#allocation12 + $0x190] sm:$0xff] }
  0xa1   : > { %660 = vmatpush1.msra.mxu0 %v585_v15  ;;  %v618_v47 = vld [vmem:[#allocation12 + $0x188] sm:$0xff]  ;;  %v617_v48 = vld [vmem:[#allocation12 + $0x180] sm:$0xff]  ;;  %v616_v49 = vld [vmem:[#allocation12 + $0x178] sm:$0xff] }
  0xa2   : > { %661 = vmatprep.subr.mxu0 %v584_v16  ;;  %v615_v50 = vld [vmem:[#allocation12 + $0x170] sm:$0xff]  ;;  %v614_v51 = vld [vmem:[#allocation12 + $0x168] sm:$0xff]  ;;  %v613_v52 = vld [vmem:[#allocation12 + $0x160] sm:$0xff] }
  0xa3   : > { %662 = vmatpush1.msra.mxu0 %v583_v17  ;;  %v612_v53 = vld [vmem:[#allocation12 + $0x158] sm:$0xff]  ;;  %v611_v54 = vld [vmem:[#allocation12 + $0x150] sm:$0xff]  ;;  %v610_v55 = vld [vmem:[#allocation12 + $0x148] sm:$0xff] }
  0xa4   : > { %663 = vmatprep.subr.mxu0 %v582_v18  ;;  %v609_v56 = vld [vmem:[#allocation12 + $0x140] sm:$0xff]  ;;  %v608_v57 = vld [vmem:[#allocation12 + $0x138] sm:$0xff]  ;;  %v607_v58 = vld [vmem:[#allocation12 + $0x130] sm:$0xff] }
  0xa5   : > { %664 = vmatpush1.msra.mxu0 %v581_v19  ;;  %v606_v59 = vld [vmem:[#allocation12 + $0x128] sm:$0xff]  ;;  %v605_v60 = vld [vmem:[#allocation12 + $0x120] sm:$0xff]  ;;  %v604_v61 = vld [vmem:[#allocation12 + $0x118] sm:$0xff] }
  0xa6   : > { %665 = vmatprep.subr.mxu0 %v580_v20  ;;  %v603_v62 = vld [vmem:[#allocation12 + $0x110] sm:$0xff]  ;;  %v602_v63 = vld [vmem:[#allocation12 + $0x108] sm:$0xff]  ;;  %v601_v0 = vld [vmem:[#allocation12 + $0x100] sm:$0xff] }
  0xa7   : > { %666 = vmatpush1.msra.mxu0 %v579_v21  ;;  %v565_v1 = vld [vmem:[%s3482_s14] sm:$0xff]  ;;  %v1386_v2 = vld [vmem:[#allocation10 + $0xf8] sm:$0xff]  ;;  %v1385_v3 = vld [vmem:[#allocation10 + $0xf0] sm:$0xff] }
  0xa8   : > { %667 = vmatprep.subr.mxu0 %v578_v22  ;;  %v568_v4 = vld [vmem:[%s3482_s14 + $0x18] sm:$0xff]  ;;  %v1384_v5 = vld [vmem:[#allocation10 + $0xe8] sm:$0xff]  ;;  %v1383_v6 = vld [vmem:[#allocation10 + $0xe0] sm:$0xff] }
  0xa9   : > { %668 = vmatpush1.msra.mxu0 %v577_v23  ;;  %v567_v7 = vld [vmem:[%s3482_s14 + $0x10] sm:$0xff]  ;;  %v1382_v8 = vld [vmem:[#allocation10 + $0xd8] sm:$0xff]  ;;  %v1352_v10 = vld [vmem:[%s3474_s24 + $0x8] sm:$0xff]  ;;  %s3106_s14 = sshll.u32 %s3208_s20, 4  ;;  %s3107_s14 = int_to_ptr.vmem [resolvable:$false] %s3106_s14 }
  0xaa   : > { %669 = vmatprep.subr.mxu0 %v576_v25  ;;  %v1381_v9 = vld [vmem:[#allocation10 + $0xd0] sm:$0xff]  ;;  %v1380_v11 = vld [vmem:[#allocation10 + $0xc8] sm:$0xff]  ;;  %v1379_v12 = vld [vmem:[#allocation10 + $0xc0] sm:$0xff]  ;;  %p3109_p6 = scmp.lt.s32.totalorder %s3693_s22, %s3107_s14 }
  0xab   : > { %670 = vmatpush1.msra.mxu0 %v575_v26  ;;  %v1378_v13 = vld [vmem:[#allocation10 + $0xb8] sm:$0xff]  ;;  %v1377_v14 = vld [vmem:[#allocation10 + $0xb0] sm:$0xff]  ;;  %v1376_v15 = vld [vmem:[#allocation10 + $0xa8] sm:$0xff] }
  0xac   : > { %671 = vmatprep.subr.mxu0 %v574_v27  ;;  %v1375_v16 = vld [vmem:[#allocation10 + $0xa0] sm:$0xff]  ;;  %v1374_v17 = vld [vmem:[#allocation10 + $0x98] sm:$0xff]  ;;  %v1373_v18 = vld [vmem:[#allocation10 + $0x90] sm:$0xff] }
  0xad   : > { %672 = vmatpush1.msra.mxu0 %v573_v28  ;;  %v1372_v19 = vld [vmem:[#allocation10 + $0x88] sm:$0xff]  ;;  %v1371_v20 = vld [vmem:[#allocation10 + $0x80] sm:$0xff]  ;;  %v1370_v21 = vld [vmem:[#allocation10 + $0x78] sm:$0xff] }
  0xae   : > { %673 = vmatprep.subr.mxu0 %v572_v29  ;;  %v1369_v22 = vld [vmem:[#allocation10 + $0x70] sm:$0xff]  ;;  %v1368_v23 = vld [vmem:[#allocation10 + $0x68] sm:$0xff]  ;;  %v1367_v24 = vld [vmem:[#allocation10 + $0x60] sm:$0xff] }
  0xaf   : > { %674 = vmatpush1.msra.mxu0 %v571_v30  ;;  %v1366_v25 = vld [vmem:[#allocation10 + $0x58] sm:$0xff]  ;;  %v1365_v26 = vld [vmem:[#allocation10 + $0x50] sm:$0xff]  ;;  %v1364_v27 = vld [vmem:[#allocation10 + $0x48] sm:$0xff] }
  0xb0   : > { %675 = vmatprep.subr.mxu0 %v570_v31  ;;  %v1363_v28 = vld [vmem:[#allocation10 + $0x40] sm:$0xff]  ;;  %v1362_v29 = vld [vmem:[#allocation10 + $0x38] sm:$0xff]  ;;  %v1361_v30 = vld [vmem:[#allocation10 + $0x30] sm:$0xff] }
  0xb1   : > { %676 = vmatpush1.msra.mxu0 %v569_v32  ;;  %v1360_v31 = vld [vmem:[#allocation10 + $0x28] sm:$0xff]  ;;  %v1359_v32 = vld [vmem:[#allocation10 + $0x20] sm:$0xff] }
  0xb2   : > { %677 = vmatprep.subr.mxu0 %v632_v33  ;;  %v1358_v33 = vld [vmem:[#allocation10 + $0x18] sm:$0xff] }
  0xb3   : > { %678 = vmatpush2.msra.mxu0 %v631_v34  ;;  %v1357_v34 = vld [vmem:[#allocation10 + $0x10] sm:$0xff] }
  0xb4   : > { %679 = vmatprep.subr.mxu0 %v630_v35  ;;  %v1356_v35 = vld [vmem:[#allocation10 + $0x8] sm:$0xff] }
  0xb5   : > { %680 = vmatpush2.msra.mxu0 %v629_v36  ;;  %v1355_v36 = vld [vmem:[#allocation10] sm:$0xff] }
  0xb6   : > { %681 = vmatprep.subr.mxu0 %v628_v37  ;;  %v1418_v37 = vld [vmem:[#allocation10 + $0x1f8] sm:$0xff] }
  0xb7   : > { %682 = vmatpush2.msra.mxu0 %v627_v38  ;;  %v1417_v38 = vld [vmem:[#allocation10 + $0x1f0] sm:$0xff] }
  0xb8   : > { %683 = vmatprep.subr.mxu0 %v626_v39  ;;  %v1416_v39 = vld [vmem:[#allocation10 + $0x1e8] sm:$0xff] }
  0xb9   : > { %684 = vmatpush2.msra.mxu0 %v625_v40  ;;  %v1415_v40 = vld [vmem:[#allocation10 + $0x1e0] sm:$0xff] }
  0xba   : > { %685 = vmatprep.subr.mxu0 %v624_v41  ;;  %v1414_v41 = vld [vmem:[#allocation10 + $0x1d8] sm:$0xff] }
  0xbb   : > { %686 = vmatpush2.msra.mxu0 %v623_v42  ;;  %v1413_v42 = vld [vmem:[#allocation10 + $0x1d0] sm:$0xff] }
  0xbc   : > { %687 = vmatprep.subr.mxu0 %v622_v43  ;;  %v1412_v43 = vld [vmem:[#allocation10 + $0x1c8] sm:$0xff] }
  0xbd   : > { %688 = vmatpush2.msra.mxu0 %v621_v44  ;;  %v1411_v44 = vld [vmem:[#allocation10 + $0x1c0] sm:$0xff] }
  0xbe   : > { %689 = vmatprep.subr.mxu0 %v620_v45  ;;  %v1410_v45 = vld [vmem:[#allocation10 + $0x1b8] sm:$0xff] }
  0xbf   : > { %690 = vmatpush2.msra.mxu0 %v619_v46  ;;  %v1409_v46 = vld [vmem:[#allocation10 + $0x1b0] sm:$0xff] }
  0xc0   : > { %691 = vmatprep.subr.mxu0 %v618_v47  ;;  %v1408_v47 = vld [vmem:[#allocation10 + $0x1a8] sm:$0xff] }
  0xc1   : > { %692 = vmatpush2.msra.mxu0 %v617_v48  ;;  %v1407_v48 = vld [vmem:[#allocation10 + $0x1a0] sm:$0xff] }
  0xc2   : > { %693 = vmatprep.subr.mxu0 %v616_v49  ;;  %v1406_v49 = vld [vmem:[#allocation10 + $0x198] sm:$0xff] }
  0xc3   : > { %694 = vmatpush2.msra.mxu0 %v615_v50  ;;  %v1405_v50 = vld [vmem:[#allocation10 + $0x190] sm:$0xff] }
  0xc4   : > { %695 = vmatprep.subr.mxu0 %v614_v51  ;;  %v1404_v51 = vld [vmem:[#allocation10 + $0x188] sm:$0xff] }
  0xc5   : > { %696 = vmatpush2.msra.mxu0 %v613_v52  ;;  %v1403_v52 = vld [vmem:[#allocation10 + $0x180] sm:$0xff] }
  0xc6   : > { %697 = vmatprep.subr.mxu0 %v612_v53  ;;  %v1402_v53 = vld [vmem:[#allocation10 + $0x178] sm:$0xff] }
  0xc7   : > { %698 = vmatpush2.msra.mxu0 %v611_v54  ;;  %v1401_v54 = vld [vmem:[#allocation10 + $0x170] sm:$0xff] }
  0xc8   : > { %699 = vmatprep.subr.mxu0 %v610_v55  ;;  %v1400_v55 = vld [vmem:[#allocation10 + $0x168] sm:$0xff] }
  0xc9   : > { %700 = vmatpush2.msra.mxu0 %v609_v56  ;;  %v1399_v56 = vld [vmem:[#allocation10 + $0x160] sm:$0xff] }
  0xca   : > { %701 = vmatprep.subr.mxu0 %v608_v57  ;;  %v1398_v57 = vld [vmem:[#allocation10 + $0x158] sm:$0xff] }
  0xcb   : > { %702 = vmatpush2.msra.mxu0 %v607_v58  ;;  %v1397_v58 = vld [vmem:[#allocation10 + $0x150] sm:$0xff] }
  0xcc   : > { %703 = vmatprep.subr.mxu0 %v606_v59  ;;  %v1396_v59 = vld [vmem:[#allocation10 + $0x148] sm:$0xff] }
  0xcd   : > { %704 = vmatpush2.msra.mxu0 %v605_v60  ;;  %v1395_v60 = vld [vmem:[#allocation10 + $0x140] sm:$0xff] }
  0xce   : > { %705 = vmatprep.subr.mxu0 %v604_v61  ;;  %v1394_v61 = vld [vmem:[#allocation10 + $0x138] sm:$0xff] }
  0xcf   : > { %706 = vmatpush2.msra.mxu0 %v603_v62  ;;  %v1393_v62 = vld [vmem:[#allocation10 + $0x130] sm:$0xff] }
  0xd0   : > { %707 = vmatprep.subr.mxu0 %v602_v63  ;;  %v1392_v63 = vld [vmem:[#allocation10 + $0x128] sm:$0xff] }
  0xd1   : > { %708 = vmatpush2.msra.mxu0 %v601_v0  ;;  %v1391_v0 = vld [vmem:[#allocation10 + $0x120] sm:$0xff] }
  0xd2   : > { %710 = vmatmul.mubr.f32.vlgmr.msra.gmra.mxu0 %v565_v1  ;;  %1431 = vmatprep.subr.mxu0 %v1386_v2  ;;  %v1390_v1 = vld [vmem:[#allocation10 + $0x118] sm:$0xff]  ;;  %v1389_v2 = vld [vmem:[#allocation10 + $0x110] sm:$0xff] }
  0xd3   : > { %1432 = vmatpush1.msra.mxu0 %v1385_v3  ;;  %715 = vmatprep.mubr.f32.mxu0 %v568_v4  ;;  %v1388_v3 = vld [vmem:[#allocation10 + $0x108] sm:$0xff]  ;;  %v1387_v4 = vld [vmem:[#allocation10 + $0x100] sm:$0xff] }
  0xd4   : > { %1433 = vmatprep.subr.mxu0 %v1384_v5  ;;  %v1351_v5 = vld [vmem:[%s3474_s24] sm:$0xff] }
  0xd5   : > { %1434 = vmatpush1.msra.mxu0 %v1383_v6  ;;  %v1354_v6 = vld [vmem:[%s3474_s24 + $0x18] sm:$0xff] }
  0xd6   : > { %716 = vmatmul.mubr.f32.gmra.mxu0 %v567_v7  ;;  %1435 = vmatprep.subr.mxu0 %v1382_v8  ;;  %v1353_v7 = vld [vmem:[%s3474_s24 + $0x10] sm:$0xff]  ;;  %v635_v8 = vlaneseq  ;;  %s3811_s24 = sld [smem:[#allocation34_spill]] }
  0xd7   : > { %1436 = vmatpush1.msra.mxu0 %v1381_v9  ;;  %1495 = vmatprep.mubr.f32.mxu0 %v1352_v10  ;;  %v3205_v10 = vmov 1983009808  }
  0xd8   : > { %1437 = vmatprep.subr.mxu0 %v1380_v11  ;;  %v636_v9 = vshrl.u32 %v635_v8, 7  ;;  %v881_v11 = vunpack.c.l.s4 %v3205_v10 }
  0xd9   : > { %1438 = vmatpush1.msra.mxu0 %v1379_v12 }
  0xda   : > { %1439 = vmatprep.subr.mxu0 %v1378_v13  ;;  %v3507_v12 = vsub.s32 0, %v636_v9  ;;  %v633_v13 = vld [vmem:[%s3752_s6] sm:$0x3] }
  0xdb   : > { %1440 = vmatpush1.msra.mxu0 %v1377_v14  ;;  %v882_v14 = vunpack.c.0.s8 %v881_v11 }
  0xdc   : > { %1441 = vmatprep.subr.mxu0 %v1376_v15  ;;  %v3512_v15 = vsub.s32 1, %v636_v9  ;;  %s3698_s11 = scalar_lea.hbm %s3811_s24, %s2733_s10 }
  0xdd   : > { %1442 = vmatpush1.msra.mxu0 %v1375_v16  ;;  %v3206_v16 = vmov 1934713408  }
  0xde   : > { %1443 = vmatprep.subr.mxu0 %v1374_v17  ;;  %v912_v17 = vunpack.c.l.s4 %v3206_v16 }
  0xdf   : > { %1444 = vmatpush1.msra.mxu0 %v1373_v18  ;;  %v638_v18 = vrot.slane %v633_v13, %v3507_v12 }
  0xe0   : > { %1445 = vmatprep.subr.mxu0 %v1372_v19  ;;  %v3515_v19 = vsub.s32 %v882_v14, %v636_v9 }
  0xe1   : > { %1446 = vmatpush1.msra.mxu0 %v1371_v20  ;;  %v642_v20 = vrot.slane %v633_v13, %v3512_v15 }
  0xe2   : > { %1447 = vmatprep.subr.mxu0 %v1370_v21 }
  0xe3   : > { %1448 = vmatpush1.msra.mxu0 %v1369_v22  ;;  %v913_v22 = vunpack.c.0.s8 %v912_v17 }
  0xe4   : > { %1449 = vmatprep.subr.mxu0 %v1368_v23 }
  0xe5   : > { %1450 = vmatpush1.msra.mxu0 %v1367_v24 }
  0xe6   : > { %1451 = vmatprep.subr.mxu0 %v1366_v25  ;;  %v3207_v25 = vmov 0.0  }
  0xe7   : > { %1452 = vmatpush1.msra.mxu0 %v1365_v26 }
  0xe8   : > { %1453 = vmatprep.subr.mxu0 %v1364_v27 }
  0xe9   : > { %1454 = vmatpush1.msra.mxu0 %v1363_v28 }
  0xea   : > { %1455 = vmatprep.subr.mxu0 %v1362_v29  ;;  %v3520_v29 = vsub.s32 %v913_v22, %v636_v9 }
  0xeb   : > { %1456 = vmatpush1.msra.mxu0 %v1361_v30 }
  0xec   : > { %1457 = vmatprep.subr.mxu0 %v1360_v31 }
  0xed   : > { %1458 = vmatpush1.msra.mxu0 %v1359_v32 }
  0xee   : > { %1459 = vmatprep.subr.mxu0 %v1358_v33 }
  0xef   : > { %1460 = vmatpush1.msra.mxu0 %v1357_v34 }
  0xf0   : > { %1461 = vmatprep.subr.mxu0 %v1356_v35 }
  0xf1   : > { %1462 = vmatpush1.msra.mxu0 %v1355_v36 }
  0xf2   : > { %1463 = vmatprep.subr.mxu0 %v1418_v37 }
  0xf3   : > { %1464 = vmatpush2.msra.mxu0 %v1417_v38 }
  0xf4   : > { %1465 = vmatprep.subr.mxu0 %v1416_v39 }
  0xf5   : > { %1466 = vmatpush2.msra.mxu0 %v1415_v40 }
  0xf6   : > { %1467 = vmatprep.subr.mxu0 %v1414_v41 }
  0xf7   : > { %1468 = vmatpush2.msra.mxu0 %v1413_v42 }
  0xf8   : > { %1469 = vmatprep.subr.mxu0 %v1412_v43 }
  0xf9   : > { %1470 = vmatpush2.msra.mxu0 %v1411_v44 }
  0xfa   : > { %1471 = vmatprep.subr.mxu0 %v1410_v45 }
  0xfb   : > { %1472 = vmatpush2.msra.mxu0 %v1409_v46 }
  0xfc   : > { %1473 = vmatprep.subr.mxu0 %v1408_v47 }
  0xfd   : > { %1474 = vmatpush2.msra.mxu0 %v1407_v48 }
  0xfe   : > { %1475 = vmatprep.subr.mxu0 %v1406_v49 }
  0xff   : > { %1476 = vmatpush2.msra.mxu0 %v1405_v50 }
 0x100   : > { %1477 = vmatprep.subr.mxu0 %v1404_v51 }
 0x101   : > { %1478 = vmatpush2.msra.mxu0 %v1403_v52 }
 0x102   : > { %1479 = vmatprep.subr.mxu0 %v1402_v53 }
 0x103   : > { %1480 = vmatpush2.msra.mxu0 %v1401_v54 }
 0x104   : > { %1481 = vmatprep.subr.mxu0 %v1400_v55 }
 0x105   : > { %1482 = vmatpush2.msra.mxu0 %v1399_v56 }
 0x106   : > { %1483 = vmatprep.subr.mxu0 %v1398_v57 }
 0x107   : > { %1484 = vmatpush2.msra.mxu0 %v1397_v58 }
 0x108   : > { %1485 = vmatprep.subr.mxu0 %v1396_v59 }
 0x109   : > { %1486 = vmatpush2.msra.mxu0 %v1395_v60 }
 0x10a   : > { %1487 = vmatprep.subr.mxu0 %v1394_v61 }
 0x10b   : > { %1488 = vmatpush2.msra.mxu0 %v1393_v62 }
 0x10c   : > { %1489 = vmatprep.subr.mxu0 %v1392_v63 }
 0x10d   : > { %1490 = vmatpush2.msra.mxu0 %v1391_v0 }
 0x10e   : > { %1491 = vmatprep.subr.mxu0 %v1390_v1 }
 0x10f   : > { %1492 = vmatpush2.msra.mxu0 %v1389_v2 }
 0x110   : > { %1493 = vmatprep.subr.mxu0 %v1388_v3 }
 0x111   : > { %1494 = vmatpush2.msra.mxu0 %v1387_v4 }
 0x112   : > { %1496 = vmatmul.mubr.f32.vlgmr.msra.gmra.mxu0 %v1351_v5 }
 0x113   : > { %1501 = vmatprep.mubr.f32.mxu0 %v1354_v6 }
 0x116   : > { %1502 = vmatmul.mubr.f32.gmra.mxu0 %v1353_v7 }
 0x192   : > { %v711_v21 = vpop.f32.mrf.mxu0 }
 0x193   : > { %v712_v23 = vadd.f32 %v711_v21, %v638_v18 }
 0x194   : > { %v713_v24 = vpop.f32.mrf.mxu0 }
 0x195   : > { %v879_v26 = vcombine.high %v712_v23, %v3207_v25  ;;  %v886_v27 = vrot.slane %v712_v23, %v3515_v19  ;;  %v714_v28 = vadd.f32 %v713_v24, %v642_v20 }
 0x196   : > { %v717_v30 = vpop.f32.mrf.mxu0 }
 0x197   : > { %v893_v31 = vrot.slane %v879_v26, %v3515_v19  ;;  %v894_v32 = vcombine.high %v714_v28, %v3207_v25  ;;  %v901_v33 = vrot.slane %v714_v28, %v3515_v19  ;;  %v718_v34 = vadd.f32 %v717_v30, %v638_v18  ;;  %v1419_v28 = vld [vmem:[%s3750_s4] sm:$0x3] }
 0x198   : > { %v719_v35 = vpop.f32.mrf.mxu0  ;;  %v1424_v30 = vrot.slane %v1419_v28, %v3507_v12 }
 0x199   : > { %v908_v36 = vrot.slane %v894_v32, %v3515_v19  ;;  %v909_v37 = vcombine.low %v886_v27, %v901_v33  ;;  %v910_v38 = vcombine.high %v886_v27, %v901_v33  ;;  %v945_v39 = vcombine.high %v718_v34, %v3207_v25 }
 0x19a   : > { %v952_v40 = vrot.slane %v718_v34, %v3515_v19  ;;  %v720_v41 = vadd.f32 %v719_v35, %v642_v20 }
 0x19b   : > { %v917_v42 = vrot.slane %v909_v37, %v3520_v29  ;;  %v924_v43 = vrot.slane %v910_v38, %v3520_v29  ;;  %v925_v44 = vcombine.low %v893_v31, %v908_v36  ;;  %v926_v45 = vcombine.high %v893_v31, %v908_v36 }
 0x19c   : > { %v959_v46 = vrot.slane %v945_v39, %v3515_v19  ;;  %v960_v47 = vcombine.high %v720_v41, %v3207_v25  ;;  %v967_v48 = vrot.slane %v720_v41, %v3515_v19  ;;  %v1428_v31 = vrot.slane %v1419_v28, %v3512_v15 }
 0x19d   : > { %v933_v49 = vrot.slane %v925_v44, %v3520_v29  ;;  %v940_v50 = vrot.slane %v926_v45, %v3520_v29  ;;  %v1011_v51 = vcombine.low %v917_v42, %v924_v43  ;;  %v2705_v52 = vcombine.high %v917_v42, %v924_v43 }
 0x19e   : > { %v974_v53 = vrot.slane %v960_v47, %v3515_v19  ;;  %v975_v54 = vcombine.low %v952_v40, %v967_v48  ;;  %v976_v55 = vcombine.high %v952_v40, %v967_v48 }
 0x19f   : > { %v1027_v56 = vcombine.low %v933_v49, %v940_v50  ;;  %v2706_v57 = vcombine.high %v933_v49, %v940_v50  ;;  %v1018_v58 = vrot.slane %v1011_v51, %v3515_v19  ;;  %v1026_v59 = vrot.slane %v2705_v52, %v3515_v19 }
 0x1a0   : > { %v983_v60 = vrot.slane %v975_v54, %v3520_v29  ;;  %v990_v61 = vrot.slane %v976_v55, %v3520_v29  ;;  %v991_v62 = vcombine.low %v959_v46, %v974_v53  ;;  %v992_v63 = vcombine.high %v959_v46, %v974_v53 }
 0x1a1   : > { %v1034_v0 = vrot.slane %v1027_v56, %v3515_v19  ;;  %v1042_v1 = vrot.slane %v2706_v57, %v3515_v19  ;;  %v1043_v2 = vcombine.low %v1018_v58, %v1026_v59 }
 0x1a2   : > { %v999_v3 = vrot.slane %v991_v62, %v3520_v29  ;;  %v1006_v4 = vrot.slane %v992_v63, %v3520_v29  ;;  %v1061_v5 = vcombine.low %v983_v60, %v990_v61  ;;  %v2707_v6 = vcombine.high %v983_v60, %v990_v61 }
 0x1a3   : > { %v1051_v7 = vcombine.low %v1034_v0, %v1042_v1  ;;  %v1050_v13 = vrot.slane %v1043_v2, %v3520_v29 }
 0x1a4   : > { %v1077_v8 = vcombine.low %v999_v3, %v1006_v4  ;;  %v2708_v9 = vcombine.high %v999_v3, %v1006_v4  ;;  %v1068_v10 = vrot.slane %v1061_v5, %v3515_v19  ;;  %v1076_v11 = vrot.slane %v2707_v6, %v3515_v19 }
 0x1a5   : > { %v1058_v14 = vrot.slane %v1051_v7, %v3520_v29 }
 0x1a6   : > { %v1084_v16 = vrot.slane %v1077_v8, %v3515_v19  ;;  %v1092_v17 = vrot.slane %v2708_v9, %v3515_v19  ;;  %v1093_v18 = vcombine.low %v1068_v10, %v1076_v11 }
 0x1a7   : > { %v3550_v20 = vcombine.high %v1050_v13, %v1058_v14  ;;  %v1059_v26 = vcombine.low %v1050_v13, %v1058_v14 }
 0x1a8   : > { %v1100_v21 = vrot.slane %v1093_v18, %v3520_v29  ;;  %v1101_v22 = vcombine.low %v1084_v16, %v1092_v17 }
 0x1aa   : > { %v1108_v23 = vrot.slane %v1101_v22, %v3520_v29 }
 0x1ac   : > { %v1109_v24 = vcombine.low %v1100_v21, %v1108_v23  ;;  %v3554_v27 = vcombine.high %v1100_v21, %v1108_v23 }
 0x1ae   : > { %2750 = vmatprep.subr.mxu0 %v1109_v24 }
 0x1af   : > { %2751 = vmatpush3.xpose.msra.mxu0 %v1109_v24 }
 0x1b0   : > { %2752 = vmatprep.subr.mxu0 %v1059_v26 }
 0x1b3   : > { %2753 = vmatpush3.xpose.msra.mxu0 %v1059_v26 }
 0x1b4   : > { %2757 = vmatprep.subr.mxu0 %v3554_v27 }
 0x1d2   : > { %v1497_v32 = vpop.f32.mrf.mxu0 }
 0x1d3   : > { %v1498_v33 = vadd.f32 %v1497_v32, %v1424_v30 }
 0x1d4   : > { %v1499_v34 = vpop.f32.mrf.mxu0 }
 0x1d5   : > { %v1508_v35 = vcombine.high %v1498_v33, %v3207_v25  ;;  %v1500_v36 = vadd.f32 %v1499_v34, %v1428_v31  ;;  %v1515_v38 = vrot.slane %v1498_v33, %v3515_v19 }
 0x1d6   : > { %v1503_v37 = vpop.f32.mrf.mxu0 }
 0x1d7   : > { %v1523_v39 = vcombine.high %v1500_v36, %v3207_v25  ;;  %v1530_v40 = vrot.slane %v1500_v36, %v3515_v19  ;;  %v1504_v41 = vadd.f32 %v1503_v37, %v1424_v30  ;;  %v1522_v43 = vrot.slane %v1508_v35, %v3515_v19 }
 0x1d8   : > { %v1505_v42 = vpop.f32.mrf.mxu0 }
 0x1d9   : > { %v1537_v44 = vrot.slane %v1523_v39, %v3515_v19  ;;  %v1538_v45 = vcombine.low %v1515_v38, %v1530_v40  ;;  %v1539_v46 = vcombine.high %v1515_v38, %v1530_v40  ;;  %v1574_v47 = vcombine.high %v1504_v41, %v3207_v25  ;;  %v757_v39 = vld [vmem:[#allocation13 + $0xf8] sm:$0xff]  ;;  %v756_v40 = vld [vmem:[#allocation13 + $0xf0] sm:$0xff] }
 0x1da   : > { %v1506_v48 = vadd.f32 %v1505_v42, %v1428_v31  ;;  %v1581_v53 = vrot.slane %v1504_v41, %v3515_v19  ;;  %v755_v41 = vld [vmem:[#allocation13 + $0xe8] sm:$0xff]  ;;  %802 = vmatprep.subr.mxu1 %v757_v39  ;;  %v754_v42 = vld [vmem:[#allocation13 + $0xe0] sm:$0xff] }
 0x1db   : > { %v1546_v49 = vrot.slane %v1538_v45, %v3520_v29  ;;  %v1553_v50 = vrot.slane %v1539_v46, %v3520_v29  ;;  %v1554_v51 = vcombine.low %v1522_v43, %v1537_v44  ;;  %v1555_v52 = vcombine.high %v1522_v43, %v1537_v44  ;;  %803 = vmatpush1.msra.mxu1 %v756_v40  ;;  %v753_v43 = vld [vmem:[#allocation13 + $0xd8] sm:$0xff]  ;;  %v752_v44 = vld [vmem:[#allocation13 + $0xd0] sm:$0xff]  ;;  %v751_v45 = vld [vmem:[#allocation13 + $0xc8] sm:$0xff] }
 0x1dc   : > { %v1589_v54 = vcombine.high %v1506_v48, %v3207_v25  ;;  %v1596_v55 = vrot.slane %v1506_v48, %v3515_v19  ;;  %v1588_v60 = vrot.slane %v1574_v47, %v3515_v19  ;;  %804 = vmatprep.subr.mxu1 %v755_v41  ;;  %v749_v46 = vld [vmem:[#allocation13 + $0xb8] sm:$0xff]  ;;  %v748_v47 = vld [vmem:[#allocation13 + $0xb0] sm:$0xff]  ;;  %v746_v48 = vld [vmem:[#allocation13 + $0xa0] sm:$0xff] }
 0x1dd   : > { %v1562_v56 = vrot.slane %v1554_v51, %v3520_v29  ;;  %v1569_v57 = vrot.slane %v1555_v52, %v3520_v29  ;;  %v1640_v58 = vcombine.low %v1546_v49, %v1553_v50  ;;  %v2713_v59 = vcombine.high %v1546_v49, %v1553_v50  ;;  %805 = vmatpush1.msra.mxu1 %v754_v42  ;;  %v745_v49 = vld [vmem:[#allocation13 + $0x98] sm:$0xff]  ;;  %v744_v50 = vld [vmem:[#allocation13 + $0x90] sm:$0xff]  ;;  %v743_v51 = vld [vmem:[#allocation13 + $0x88] sm:$0xff] }
 0x1de   : > { %v1603_v61 = vrot.slane %v1589_v54, %v3515_v19  ;;  %v1604_v62 = vcombine.low %v1581_v53, %v1596_v55  ;;  %v1605_v63 = vcombine.high %v1581_v53, %v1596_v55  ;;  %806 = vmatprep.subr.mxu1 %v753_v43  ;;  %v742_v52 = vld [vmem:[#allocation13 + $0x80] sm:$0xff]  ;;  %v741_v53 = vld [vmem:[#allocation13 + $0x78] sm:$0xff]  ;;  %v740_v54 = vld [vmem:[#allocation13 + $0x70] sm:$0xff] }
 0x1df   : > { %v1656_v0 = vcombine.low %v1562_v56, %v1569_v57  ;;  %v2714_v1 = vcombine.high %v1562_v56, %v1569_v57  ;;  %v1647_v2 = vrot.slane %v1640_v58, %v3515_v19  ;;  %v1655_v3 = vrot.slane %v2713_v59, %v3515_v19  ;;  %807 = vmatpush1.msra.mxu1 %v752_v44  ;;  %v739_v55 = vld [vmem:[#allocation13 + $0x68] sm:$0xff]  ;;  %v738_v56 = vld [vmem:[#allocation13 + $0x60] sm:$0xff]  ;;  %v737_v57 = vld [vmem:[#allocation13 + $0x58] sm:$0xff] }
 0x1e0   : > { %v1612_v4 = vrot.slane %v1604_v62, %v3520_v29  ;;  %v1619_v5 = vrot.slane %v1605_v63, %v3520_v29  ;;  %v1620_v6 = vcombine.low %v1588_v60, %v1603_v61  ;;  %v1621_v7 = vcombine.high %v1588_v60, %v1603_v61  ;;  %808 = vmatprep.subr.mxu1 %v751_v45  ;;  %v736_v58 = vld [vmem:[#allocation13 + $0x50] sm:$0xff]  ;;  %v735_v59 = vld [vmem:[#allocation13 + $0x48] sm:$0xff]  ;;  %v734_v60 = vld [vmem:[#allocation13 + $0x40] sm:$0xff] }
 0x1e1   : > { %v1663_v8 = vrot.slane %v1656_v0, %v3515_v19  ;;  %v1671_v9 = vrot.slane %v2714_v1, %v3515_v19  ;;  %v1672_v10 = vcombine.low %v1647_v2, %v1655_v3  ;;  %v723_v61 = vld [vmem:[%s3489_s3 + $0x8] sm:$0xff]  ;;  %v733_v62 = vld [vmem:[#allocation13 + $0x38] sm:$0xff]  ;;  %v732_v63 = vld [vmem:[#allocation13 + $0x30] sm:$0xff] }
 0x1e2   : > { %v1628_v11 = vrot.slane %v1620_v6, %v3520_v29  ;;  %v1635_v13 = vrot.slane %v1621_v7, %v3520_v29  ;;  %v1690_v14 = vcombine.low %v1612_v4, %v1619_v5  ;;  %v2715_v16 = vcombine.high %v1612_v4, %v1619_v5  ;;  %866 = vmatprep.mubr.f32.mxu1 %v723_v61  ;;  %v731_v0 = vld [vmem:[#allocation13 + $0x28] sm:$0xff]  ;;  %v730_v1 = vld [vmem:[#allocation13 + $0x20] sm:$0xff]  ;;  %v729_v2 = vld [vmem:[#allocation13 + $0x18] sm:$0xff] }
 0x1e3   : > { %v1680_v17 = vcombine.low %v1663_v8, %v1671_v9  ;;  %v1679_v24 = vrot.slane %v1672_v10, %v3520_v29  ;;  %v728_v3 = vld [vmem:[#allocation13 + $0x10] sm:$0xff]  ;;  %v727_v4 = vld [vmem:[#allocation13 + $0x8] sm:$0xff]  ;;  %v726_v5 = vld [vmem:[#allocation13] sm:$0xff] }
 0x1e4   : > { %v1697_v18 = vrot.slane %v1690_v14, %v3515_v19  ;;  %v1705_v21 = vrot.slane %v2715_v16, %v3515_v19  ;;  %v1706_v22 = vcombine.low %v1628_v11, %v1635_v13  ;;  %v2716_v23 = vcombine.high %v1628_v11, %v1635_v13  ;;  %v789_v6 = vld [vmem:[#allocation13 + $0x1f8] sm:$0xff]  ;;  %v788_v7 = vld [vmem:[#allocation13 + $0x1f0] sm:$0xff]  ;;  %v787_v8 = vld [vmem:[#allocation13 + $0x1e8] sm:$0xff] }
 0x1e5   : > { %v1687_v26 = vrot.slane %v1680_v17, %v3520_v29  ;;  %v786_v9 = vld [vmem:[#allocation13 + $0x1e0] sm:$0xff]  ;;  %v785_v10 = vld [vmem:[#allocation13 + $0x1d8] sm:$0xff]  ;;  %v784_v11 = vld [vmem:[#allocation13 + $0x1d0] sm:$0xff] }
 0x1e6   : > { %v1713_v28 = vrot.slane %v1706_v22, %v3515_v19  ;;  %v1721_v30 = vrot.slane %v2716_v23, %v3515_v19  ;;  %v1722_v31 = vcombine.low %v1697_v18, %v1705_v21  ;;  %v783_v13 = vld [vmem:[#allocation13 + $0x1c8] sm:$0xff]  ;;  %v782_v14 = vld [vmem:[#allocation13 + $0x1c0] sm:$0xff]  ;;  %v781_v16 = vld [vmem:[#allocation13 + $0x1b8] sm:$0xff] }
 0x1e7   : > { %v1688_v32 = vcombine.low %v1679_v24, %v1687_v26  ;;  %v1689_v37 = vcombine.high %v1679_v24, %v1687_v26  ;;  %v780_v17 = vld [vmem:[#allocation13 + $0x1b0] sm:$0xff]  ;;  %v779_v18 = vld [vmem:[#allocation13 + $0x1a8] sm:$0xff]  ;;  %v778_v21 = vld [vmem:[#allocation13 + $0x1a0] sm:$0xff] }
 0x1e8   : > { %v1730_v33 = vcombine.low %v1713_v28, %v1721_v30  ;;  %v1729_v34 = vrot.slane %v1722_v31, %v3520_v29  ;;  %v777_v22 = vld [vmem:[#allocation13 + $0x198] sm:$0xff]  ;;  %v776_v23 = vld [vmem:[#allocation13 + $0x190] sm:$0xff]  ;;  %v775_v24 = vld [vmem:[#allocation13 + $0x188] sm:$0xff] }
 0x1e9   : > { %2754 = vmatprep.mubr.f32.mxu0 %v1688_v32  ;;  %v774_v26 = vld [vmem:[#allocation13 + $0x180] sm:$0xff]  ;;  %v773_v28 = vld [vmem:[#allocation13 + $0x178] sm:$0xff]  ;;  %v772_v30 = vld [vmem:[#allocation13 + $0x170] sm:$0xff] }
 0x1ea   : > { %v1737_v35 = vrot.slane %v1730_v33, %v3520_v29  ;;  %v771_v31 = vld [vmem:[#allocation13 + $0x168] sm:$0xff]  ;;  %v770_v32 = vld [vmem:[#allocation13 + $0x160] sm:$0xff]  ;;  %v769_v33 = vld [vmem:[#allocation13 + $0x158] sm:$0xff] }
 0x1eb   : > { %v763_v39 = vld [vmem:[#allocation13 + $0x128] sm:$0xff]  ;;  %v762_v40 = vld [vmem:[#allocation13 + $0x120] sm:$0xff]  ;;  %v761_v41 = vld [vmem:[#allocation13 + $0x118] sm:$0xff] }
 0x1ec   : > { %v1738_v36 = vcombine.low %v1729_v34, %v1737_v35  ;;  %v1739_v38 = vcombine.high %v1729_v34, %v1737_v35  ;;  %v768_v34 = vld [vmem:[#allocation13 + $0x150] sm:$0xff]  ;;  %v767_v35 = vld [vmem:[#allocation13 + $0x148] sm:$0xff]  ;;  %v758_v44 = vld [vmem:[#allocation13 + $0x100] sm:$0xff] }
 0x1ed   : > { %v760_v42 = vld [vmem:[#allocation13 + $0x110] sm:$0xff]  ;;  %v759_v43 = vld [vmem:[#allocation13 + $0x108] sm:$0xff]  ;;  %v722_v45 = vld [vmem:[%s3489_s3] sm:$0xff] }
 0x1ee   : > { %2755 = vmatmul.mubr.f32.vlgmr.msra.gmra.mxu0 %v1738_v36  ;;  %v766_v36 = vld [vmem:[#allocation13 + $0x140] sm:$0xff] }
 0x1ef   : > { %2758 = vmatpush3.xpose.msra.mxu0 %v3554_v27  ;;  %2761 = vmatprep.mubr.f32.mxu0 %v1689_v37  ;;  %v750_v27 = vld [vmem:[#allocation13 + $0xc0] sm:$0xff]  ;;  %v765_v37 = vld [vmem:[#allocation13 + $0x138] sm:$0xff] }
 0x1f0   : > { %2759 = vmatprep.subr.mxu0 %v3550_v20  ;;  %809 = vmatpush1.msra.mxu1 %v750_v27  ;;  %v725_v27 = vld [vmem:[%s3489_s3 + $0x18] sm:$0xff] }
 0x1f1   : > { %810 = vmatprep.subr.mxu1 %v749_v46  ;;  %v724_v46 = vld [vmem:[%s3489_s3 + $0x10] sm:$0xff]  ;;  %s3108_s3 = scalar_lea.vmem %s3107_s14, 1024 }
 0x1f2   : > { %811 = vmatpush1.msra.mxu1 %v748_v47  ;;  %p3110_p9 = scmp.lt.s32.totalorder %s3108_s3, %s3102_s27 }
 0x1f3   : > { %2760 = vmatpush3.xpose.msra.mxu0 %v3550_v20  ;;  %v747_v20 = vld [vmem:[#allocation13 + $0xa8] sm:$0xff] }
 0x1f4   : > { %812 = vmatprep.subr.mxu1 %v747_v20  ;;  %p3111_p13 = por %p3110_p9, %p3109_p6 }
 0x1f5   : > { %813 = vmatpush1.msra.mxu1 %v746_v48 }
 0x1f6   : > { %2762 = vmatmul.mubr.f32.vlgmr.msra.gmra.mxu0 %v1739_v38  ;;  %814 = vmatprep.subr.mxu1 %v745_v49  ;;  %v764_v38 = vld [vmem:[#allocation13 + $0x130] sm:$0xff]  ;;  %p3112_p0 = pnand %p3111_p13, %p3105_p3 }
 0x1f7   : > { %815 = vmatpush1.msra.mxu1 %v744_v50 }
 0x1f8   : > { %816 = vmatprep.subr.mxu1 %v743_v51 }
 0x1f9   : > { %817 = vmatpush1.msra.mxu1 %v742_v52 }
 0x1fa   : > { %818 = vmatprep.subr.mxu1 %v741_v53 }
 0x1fb   : > { %819 = vmatpush1.msra.mxu1 %v740_v54 }
 0x1fc   : > { %820 = vmatprep.subr.mxu1 %v739_v55 }
 0x1fd   : > { %821 = vmatpush1.msra.mxu1 %v738_v56 }
 0x1fe   : > { %822 = vmatprep.subr.mxu1 %v737_v57  ;;  %v790_v57 = vld [vmem:[%s3754_s8] sm:$0x3] }
 0x1ff   : > { %823 = vmatpush1.msra.mxu1 %v736_v58  ;;  %v795_v61 = vrot.slane %v790_v57, %v3507_v12 }
 0x200   : > { %824 = vmatprep.subr.mxu1 %v735_v59 }
 0x201   : > { %825 = vmatpush1.msra.mxu1 %v734_v60 }
 0x202   : > { %826 = vmatprep.subr.mxu1 %v733_v62 }
 0x203   : > { %827 = vmatpush1.msra.mxu1 %v732_v63 }
 0x204   : > { %828 = vmatprep.subr.mxu1 %v731_v0  ;;  %v799_v0 = vrot.slane %v790_v57, %v3512_v15 }
 0x205   : > { %829 = vmatpush1.msra.mxu1 %v730_v1 }
 0x206   : > { %830 = vmatprep.subr.mxu1 %v729_v2 }
 0x207   : > { %831 = vmatpush1.msra.mxu1 %v728_v3 }
 0x208   : > { %832 = vmatprep.subr.mxu1 %v727_v4 }
 0x209   : > { %833 = vmatpush1.msra.mxu1 %v726_v5 }
 0x20a   : > { %834 = vmatprep.subr.mxu1 %v789_v6 }
 0x20b   : > { %835 = vmatpush2.msra.mxu1 %v788_v7 }
 0x20c   : > { %836 = vmatprep.subr.mxu1 %v787_v8 }
 0x20d   : > { %837 = vmatpush2.msra.mxu1 %v786_v9 }
 0x20e   : > { %838 = vmatprep.subr.mxu1 %v785_v10 }
 0x20f   : > { %839 = vmatpush2.msra.mxu1 %v784_v11 }
 0x210   : > { %840 = vmatprep.subr.mxu1 %v783_v13 }
 0x211   : > { %841 = vmatpush2.msra.mxu1 %v782_v14 }
 0x212   : > { %842 = vmatprep.subr.mxu1 %v781_v16 }
 0x213   : > { %843 = vmatpush2.msra.mxu1 %v780_v17 }
 0x214   : > { %844 = vmatprep.subr.mxu1 %v779_v18 }
 0x215   : > { %845 = vmatpush2.msra.mxu1 %v778_v21 }
 0x216   : > { %846 = vmatprep.subr.mxu1 %v777_v22 }
 0x217   : > { %847 = vmatpush2.msra.mxu1 %v776_v23 }
 0x218   : > { %848 = vmatprep.subr.mxu1 %v775_v24 }
 0x219   : > { %849 = vmatpush2.msra.mxu1 %v774_v26 }
 0x21a   : > { %850 = vmatprep.subr.mxu1 %v773_v28 }
 0x21b   : > { %851 = vmatpush2.msra.mxu1 %v772_v30 }
 0x21c   : > { %852 = vmatprep.subr.mxu1 %v771_v31 }
 0x21d   : > { %853 = vmatpush2.msra.mxu1 %v770_v32 }
 0x21e   : > { %854 = vmatprep.subr.mxu1 %v769_v33 }
 0x21f   : > { %855 = vmatpush2.msra.mxu1 %v768_v34 }
 0x220   : > { %856 = vmatprep.subr.mxu1 %v767_v35 }
 0x221   : > { %857 = vmatpush2.msra.mxu1 %v766_v36 }
 0x222   : > { %858 = vmatprep.subr.mxu1 %v765_v37 }
 0x223   : > { %859 = vmatpush2.msra.mxu1 %v764_v38 }
 0x224   : > { %860 = vmatprep.subr.mxu1 %v763_v39 }
 0x225   : > { %861 = vmatpush2.msra.mxu1 %v762_v40 }
 0x226   : > { %862 = vmatprep.subr.mxu1 %v761_v41 }
 0x227   : > { %863 = vmatpush2.msra.mxu1 %v760_v42 }
 0x228   : > { %864 = vmatprep.subr.mxu1 %v759_v43 }
 0x229   : > { %865 = vmatpush2.msra.mxu1 %v758_v44 }
 0x22a   : > { %867 = vmatmul.mubr.f32.vlgmr.msra.gmra.mxu1 %v722_v45 }
 0x22b   : > { %872 = vmatprep.mubr.f32.mxu1 %v725_v27 }
 0x22e   : > { %873 = vmatmul.mubr.f32.gmra.mxu1 %v724_v46 }
 0x2ae   : > { %v2756_v47 = vpop.f32.mrf.mxu0 }
 0x2af   : > { %v1898_v49 = vsel %vm1894_vm0, %v2756_v47, -inf }
 0x2b0   : > { %v1810_v20 = vpop.f32.mrf.mxu0 }
 0x2b1   : > { %v1895_v48 = vsel %vm1894_vm0, %v1810_v20, -inf }
 0x2b2   : > { %1896 = vmax.xlane.f32.xlu0 %v1895_v48 }
 0x2b6   : > { %v2763_v50 = vpop.f32.mrf.mxu0  ;;  %1899 = vmax.xlane.f32.xlu0 %v1898_v49 }
 0x2b7   : > { %v1904_v53 = vsel %vm1894_vm0, %v2763_v50, -inf }
 0x2b8   : > { %v1885_v51 = vpop.f32.mrf.mxu0 }
 0x2b9   : > { %v1901_v52 = vsel %vm1894_vm0, %v1885_v51, -inf }
 0x2ba   : > { %1902 = vmax.xlane.f32.xlu1 %v1901_v52 }
 0x2be   : > { %1905 = vmax.xlane.f32.xlu1 %v1904_v53 }
 0x2ea   : > { %v868_v59 = vpop.f32.mrf.mxu1 }
 0x2eb   : > { %v869_v4 = vadd.f32 %v868_v59, %v795_v61 }
 0x2ec   : > { %v870_v62 = vpop.f32.mrf.mxu1 }
 0x2ed   : > { %v871_v5 = vadd.f32 %v870_v62, %v799_v0  ;;  %v1115_v14 = vcombine.high %v869_v4, %v3207_v25  ;;  %v1122_v24 = vrot.slane %v869_v4, %v3515_v19 }
 0x2ee   : > { %v874_v2 = vpop.f32.mrf.mxu1 }
 0x2ef   : > { %v875_v6 = vadd.f32 %v874_v2, %v795_v61  ;;  %v1130_v16 = vcombine.high %v871_v5, %v3207_v25  ;;  %v1129_v28 = vrot.slane %v1115_v14, %v3515_v19  ;;  %v1137_v30 = vrot.slane %v871_v5, %v3515_v19 }
 0x2f0   : > { %v876_v7 = vpop.f32.mrf.mxu1 }
 0x2f1   : > { %v877_v9 = vadd.f32 %v876_v7, %v799_v0  ;;  %v1181_v11 = vcombine.high %v875_v6, %v3207_v25  ;;  %v1188_v17 = vrot.slane %v875_v6, %v3515_v19  ;;  %v1144_v31 = vrot.slane %v1130_v16, %v3515_v19 }
 0x2f2   : > { %v1145_v38 = vcombine.low %v1122_v24, %v1137_v30  ;;  %v1146_v39 = vcombine.high %v1122_v24, %v1137_v30 }
 0x2f3   : > { %v1195_v18 = vrot.slane %v1181_v11, %v3515_v19  ;;  %v1196_v21 = vcombine.high %v877_v9, %v3207_v25  ;;  %v1203_v23 = vrot.slane %v877_v9, %v3515_v19  ;;  %v1161_v40 = vcombine.low %v1129_v28, %v1144_v31 }
 0x2f4   : > { %v1162_v41 = vcombine.high %v1129_v28, %v1144_v31 }
 0x2f5   : > { %v1210_v26 = vrot.slane %v1196_v21, %v3515_v19  ;;  %v1211_v33 = vcombine.low %v1188_v17, %v1203_v23  ;;  %v1212_v34 = vcombine.high %v1188_v17, %v1203_v23  ;;  %v1169_v48 = vrot.slane %v1161_v40, %v3520_v29  ;;  %v2366_v40 = vld [vmem:[#allocation15 + $0xe8] sm:$0xff] }
 0x2f6   : > { %v1176_v49 = vrot.slane %v1162_v41, %v3520_v29  ;;  %v2364_v41 = vld [vmem:[#allocation15 + $0xd8] sm:$0xff] }
 0x2f7   : > { %v1227_v35 = vcombine.low %v1195_v18, %v1210_v26  ;;  %v1228_v36 = vcombine.high %v1195_v18, %v1210_v26  ;;  %v1219_v43 = vrot.slane %v1211_v33, %v3520_v29  ;;  %v1226_v44 = vrot.slane %v1212_v34, %v3520_v29 }
 0x2f8   : > { %v2710_v59 = vcombine.high %v1169_v48, %v1176_v49 }
 0x2f9   : > { %v1235_v45 = vrot.slane %v1227_v35, %v3520_v29  ;;  %v1242_v27 = vrot.slane %v1228_v36, %v3520_v29  ;;  %v2711_v52 = vcombine.high %v1219_v43, %v1226_v44  ;;  %v2368_v35 = vld [vmem:[#allocation15 + $0xf8] sm:$0xff] }
 0x2fa   : > { %v1278_v7 = vrot.slane %v2710_v59, %v3515_v19  ;;  %v2344_v59 = vld [vmem:[#allocation15 + $0x38] sm:$0xff] }
 0x2fb   : > { %v1313_v53 = vcombine.low %v1235_v45, %v1242_v27  ;;  %v1312_v62 = vrot.slane %v2711_v52, %v3515_v19  ;;  %v2351_v52 = vld [vmem:[#allocation15 + $0x70] sm:$0xff] }
 0x33b   : > { %v1897_v54 = vpop.xlane.xlu0 %1896 }
 0x33c   : > { %v1907_v55 = vsub.f32 %v1810_v20, %v1897_v54  ;;  %v1160_v20 = vrot.slane %v1146_v39, %v3520_v29  ;;  %v2712_v54 = vcombine.high %v1235_v45, %v1242_v27  ;;  %v2367_v39 = vld [vmem:[#allocation15 + $0xf0] sm:$0xff]  ;;  %v2360_v45 = vld [vmem:[#allocation15 + $0xb8] sm:$0xff] }
 0x33d   : > { %v2359_v27 = vld [vmem:[#allocation15 + $0xb0] sm:$0xff] }
 0x33e   : > { %v1911_v56 = vmul.f32 1.442695, %v1907_v55  ;;  %v1328_v0 = vrot.slane %v2712_v54, %v3515_v19  ;;  %v2349_v54 = vld [vmem:[#allocation15 + $0x60] sm:$0xff] }
 0x33f   : > { %v1900_v58 = vpop.xlane.xlu0 %1899 }
 0x340   : > { %2898 = vpow2.f32 %v1911_v56  ;;  %v1908_v60 = vsub.f32 %v2756_v47, %v1900_v58  ;;  %v1153_v47 = vrot.slane %v1145_v38, %v3520_v29  ;;  %v1263_v58 = vcombine.low %v1169_v48, %v1176_v49  ;;  %v2355_v48 = vld [vmem:[#allocation15 + $0x90] sm:$0xff]  ;;  %v2354_v49 = vld [vmem:[#allocation15 + $0x88] sm:$0xff] }
 0x342   : > { %v1913_v63 = vmul.f32 1.442695, %v1908_v60  ;;  %v1247_v56 = vcombine.low %v1153_v47, %v1160_v20  ;;  %v2709_v57 = vcombine.high %v1153_v47, %v1160_v20  ;;  %v1270_v6 = vrot.slane %v1263_v58, %v3515_v19  ;;  %v2357_v47 = vld [vmem:[#allocation15 + $0xa0] sm:$0xff]  ;;  %v2356_v20 = vld [vmem:[#allocation15 + $0x98] sm:$0xff] }
 0x343   : > { %v1903_v1 = vpop.xlane.xlu1 %1902  ;;  %v2345_v58 = vld [vmem:[#allocation15 + $0x40] sm:$0xff] }
 0x344   : > { %2900 = vpow2.f32 %v1913_v63  ;;  %v1909_v3 = vsub.f32 %v1885_v51, %v1903_v1  ;;  %v1297_v51 = vcombine.low %v1219_v43, %v1226_v44  ;;  %v1320_v63 = vrot.slane %v1313_v53, %v3515_v19  ;;  %v2362_v43 = vld [vmem:[#allocation15 + $0xc8] sm:$0xff]  ;;  %v2361_v44 = vld [vmem:[#allocation15 + $0xc0] sm:$0xff] }
 0x345   : > { %v1254_v4 = vrot.slane %v1247_v56, %v3515_v19  ;;  %v1262_v5 = vrot.slane %v2709_v57, %v3515_v19  ;;  %v1287_v11 = vcombine.low %v1270_v6, %v1278_v7  ;;  %v2350_v53 = vld [vmem:[#allocation15 + $0x68] sm:$0xff]  ;;  %v2347_v56 = vld [vmem:[#allocation15 + $0x50] sm:$0xff]  ;;  %v2397_v6 = vld [vmem:[#allocation15 + $0x1e0] sm:$0xff] }
 0x346   : > { %v1915_v8 = vmul.f32 1.442695, %v1909_v3  ;;  %v1304_v61 = vrot.slane %v1297_v51, %v3515_v19  ;;  %v1337_v3 = vcombine.low %v1320_v63, %v1328_v0  ;;  %v2352_v51 = vld [vmem:[#allocation15 + $0x78] sm:$0xff]  ;;  %v2346_v57 = vld [vmem:[#allocation15 + $0x48] sm:$0xff]  ;;  %v2339_v0 = vld [vmem:[#allocation15 + $0x10] sm:$0xff] }
 0x347   : > { %v1906_v10 = vpop.xlane.xlu1 %1905  ;;  %v1294_v16 = vrot.slane %v1287_v11, %v3520_v29  ;;  %v2340_v63 = vld [vmem:[#allocation15 + $0x18] sm:$0xff] }
 0x348   : > { %2902 = vpow2.f32 %v1915_v8  ;;  %v1910_v13 = vsub.f32 %v2763_v50, %v1906_v10  ;;  %v1329_v2 = vcombine.low %v1304_v61, %v1312_v62  ;;  %v1344_v9 = vrot.slane %v1337_v3, %v3520_v29  ;;  %v2342_v61 = vld [vmem:[#allocation15 + $0x28] sm:$0xff]  ;;  %v2341_v62 = vld [vmem:[#allocation15 + $0x20] sm:$0xff]  ;;  %v2400_v3 = vld [vmem:[#allocation15 + $0x1f8] sm:$0xff] }
 0x349   : > { %v1279_v10 = vcombine.low %v1254_v4, %v1262_v5  ;;  %v2399_v4 = vld [vmem:[#allocation15 + $0x1f0] sm:$0xff]  ;;  %v2398_v5 = vld [vmem:[#allocation15 + $0x1e8] sm:$0xff]  ;;  %v2396_v7 = vld [vmem:[#allocation15 + $0x1d8] sm:$0xff] }
 0x34a   : > { %v1917_v22 = vmul.f32 1.442695, %v1910_v13  ;;  %v1336_v8 = vrot.slane %v1329_v2, %v3520_v29  ;;  %v2337_v2 = vld [vmem:[#allocation15] sm:$0xff]  ;;  %v2392_v11 = vld [vmem:[#allocation15 + $0x1b8] sm:$0xff] }
 0x34b   : > { %v1286_v14 = vrot.slane %v1279_v10, %v3520_v29  ;;  %v2393_v10 = vld [vmem:[#allocation15 + $0x1c0] sm:$0xff] }
 0x34c   : > { %2904 = vpow2.f32 %v1917_v22  ;;  %v1345_v13 = vcombine.low %v1336_v8, %v1344_v9  ;;  %v1346_v21 = vcombine.high %v1336_v8, %v1344_v9  ;;  %v2395_v8 = vld [vmem:[#allocation15 + $0x1d0] sm:$0xff]  ;;  %v2394_v9 = vld [vmem:[#allocation15 + $0x1c8] sm:$0xff] }
 0x34d   : > { %v3622_v32 = vpop.eup %2898  ;;  %v1295_v17 = vcombine.low %v1286_v14, %v1294_v16  ;;  %v1296_v18 = vcombine.high %v1286_v14, %v1294_v16  ;;  %v2390_v14 = vld [vmem:[#allocation15 + $0x1a8] sm:$0xff]  ;;  %v2389_v16 = vld [vmem:[#allocation15 + $0x1a0] sm:$0xff] }
 0x34e   : > { %v1919_v37 = vsel %vm1894_vm0, %v3622_v32, 0.0  ;;  %2764 = vmatprep.subr.mxu1 %v1345_v13 }
 0x34f   : > { %1920 = vadd.xlane.f32.xlu0 %v1919_v37  ;;  %2765 = vmatpush3.msra.mxu1 %v1345_v13  ;;  %v2391_v13 = vld [vmem:[#allocation15 + $0x1b0] sm:$0xff] }
 0x350   : > { %2766 = vmatprep.subr.mxu1 %v1295_v17 }
 0x351   : > { %v2901_v42 = vpop.eup %2900  ;;  %2767 = vmatpush3.msra.mxu1 %v1295_v17  ;;  %v2388_v17 = vld [vmem:[#allocation15 + $0x198] sm:$0xff] }
 0x352   : > { %v1922_v46 = vsel %vm1894_vm0, %v2901_v42, 0.0  ;;  %2771 = vmatprep.subr.mxu1 %v1346_v21 }
 0x353   : > { %1923 = vadd.xlane.f32.xlu1 %v1922_v46  ;;  %v2358_v46 = vld [vmem:[#allocation15 + $0xa8] sm:$0xff] }
 0x355   : > { %v2903_v50 = vpop.eup %2902 }
 0x356   : > { %v1925_v55 = vsel %vm1894_vm0, %v2903_v50, 0.0 }
 0x357   : > { %1926 = vadd.xlane.f32.xlu0 %v1925_v55  ;;  %v2348_v55 = vld [vmem:[#allocation15 + $0x58] sm:$0xff] }
 0x359   : > { %v2905_v60 = vpop.eup %2904 }
 0x35a   : > { %v1928_v1 = vsel %vm1894_vm0, %v2905_v60, 0.0 }
 0x35b   : > { %1929 = vadd.xlane.f32.xlu1 %v1928_v1  ;;  %v2338_v1 = vld [vmem:[#allocation15 + $0x8] sm:$0xff] }
 0x3d8   : > { %v1921_v22 = vpop.xlane.xlu0 %1920 }
 0x3d9   : > { %2906 = vrcp.f32 %v1921_v22  ;;  %v2385_v22 = vld [vmem:[#allocation15 + $0x180] sm:$0xff] }
 0x3dc   : > { %v1924_v23 = vpop.xlane.xlu1 %1923 }
 0x3dd   : > { %2908 = vrcp.f32 %v1924_v23  ;;  %v2384_v23 = vld [vmem:[#allocation15 + $0x178] sm:$0xff] }
 0x3e0   : > { %v1927_v24 = vpop.xlane.xlu0 %1926 }
 0x3e1   : > { %2910 = vrcp.f32 %v1927_v24  ;;  %v2383_v24 = vld [vmem:[#allocation15 + $0x170] sm:$0xff] }
 0x3e4   : > { %v1930_v26 = vpop.xlane.xlu1 %1929 }
 0x3e5   : > { %2912 = vrcp.f32 %v1930_v26  ;;  %v2382_v26 = vld [vmem:[#allocation15 + $0x168] sm:$0xff] }
 0x3e6   : > { %v2907_v28 = vpop.eup %2906 }
 0x3e7   : > { %v1932_v30 = vmul.f32 %v2907_v28, %v3622_v32  ;;  %v2365_v32 = vld [vmem:[#allocation15 + $0xe0] sm:$0xff] }
 0x3e8   : > { %v2381_v28 = vld [vmem:[#allocation15 + $0x160] sm:$0xff] }
 0x3e9   : > { %2768 = vmatprep.mubr.msk.f32.mxu1 %vm1894_vm0, %v1932_v30  ;;  %v2380_v30 = vld [vmem:[#allocation15 + $0x158] sm:$0xff] }
 0x3ea   : > { %v2909_v31 = vpop.eup %2908 }
 0x3eb   : > { %v1934_v33 = vmul.f32 %v2909_v31, %v2901_v42  ;;  %v2363_v42 = vld [vmem:[#allocation15 + $0xd0] sm:$0xff] }
 0x3ec   : > { %v2379_v31 = vld [vmem:[#allocation15 + $0x150] sm:$0xff] }
 0x3ed   : > { %2769 = vmatmul.mubr.msk.f32.vlgmr.msra.gmra.mxu1 %vm1894_vm0, %v1934_v33  ;;  %v2378_v33 = vld [vmem:[#allocation15 + $0x148] sm:$0xff] }
 0x3ee   : > { %v2911_v34 = vpop.eup %2910  ;;  %2772 = vmatpush3.msra.mxu1 %v1346_v21  ;;  %v2386_v21 = vld [vmem:[#allocation15 + $0x188] sm:$0xff] }
 0x3ef   : > { %2773 = vmatprep.subr.mxu1 %v1296_v18  ;;  %v1936_v36 = vmul.f32 %v2911_v34, %v2903_v50  ;;  %v2353_v50 = vld [vmem:[#allocation15 + $0x80] sm:$0xff] }
 0x3f0   : > { %2774 = vmatpush3.msra.mxu1 %v1296_v18  ;;  %v2387_v18 = vld [vmem:[#allocation15 + $0x190] sm:$0xff]  ;;  %v2377_v34 = vld [vmem:[#allocation15 + $0x140] sm:$0xff] }
 0x3f1   : > { %2775 = vmatprep.mubr.msk.f32.mxu1 %vm1894_vm0, %v1936_v36  ;;  %2413 = vmatprep.subr.mxu1 %v2368_v35  ;;  %v2376_v35 = vld [vmem:[#allocation15 + $0x138] sm:$0xff]  ;;  %v2375_v36 = vld [vmem:[#allocation15 + $0x130] sm:$0xff] }
 0x3f2   : > { %v2913_v37 = vpop.eup %2912 }
 0x3f3   : > { %v1938_v38 = vmul.f32 %v2913_v37, %v2905_v60  ;;  %v2343_v60 = vld [vmem:[#allocation15 + $0x30] sm:$0xff]  ;;  %v2374_v37 = vld [vmem:[#allocation15 + $0x128] sm:$0xff] }
 0x3f5   : > { %2776 = vmatmul.mubr.msk.f32.vlgmr.msra.gmra.mxu1 %vm1894_vm0, %v1938_v38  ;;  %v2373_v38 = vld [vmem:[#allocation15 + $0x120] sm:$0xff] }
 0x3f6   : > { %2414 = vmatpush1.msra.mxu1 %v2367_v39  ;;  %v2372_v39 = vld [vmem:[#allocation15 + $0x118] sm:$0xff] }
 0x3f7   : > { %2415 = vmatprep.subr.mxu1 %v2366_v40  ;;  %v2371_v40 = vld [vmem:[#allocation15 + $0x110] sm:$0xff] }
 0x3f8   : > { %2416 = vmatpush1.msra.mxu1 %v2365_v32  ;;  %v2370_v32 = vld [vmem:[#allocation15 + $0x108] sm:$0xff] }
 0x3f9   : > { %2417 = vmatprep.subr.mxu1 %v2364_v41  ;;  %v2369_v41 = vld [vmem:[#allocation15 + $0x100] sm:$0xff] }
 0x3fa   : > { %2418 = vmatpush1.msra.mxu1 %v2363_v42 }
 0x3fb   : > { %2419 = vmatprep.subr.mxu1 %v2362_v43 }
 0x3fc   : > { %2420 = vmatpush1.msra.mxu1 %v2361_v44 }
 0x3fd   : > { %2421 = vmatprep.subr.mxu1 %v2360_v45 }
 0x3fe   : > { %2422 = vmatpush1.msra.mxu1 %v2359_v27 }
 0x3ff   : > { %2423 = vmatprep.subr.mxu1 %v2358_v46 }
 0x400   : > { %2424 = vmatpush1.msra.mxu1 %v2357_v47 }
 0x401   : > { %2425 = vmatprep.subr.mxu1 %v2356_v20 }
 0x402   : > { %2426 = vmatpush1.msra.mxu1 %v2355_v48 }
 0x403   : > { %2427 = vmatprep.subr.mxu1 %v2354_v49 }
 0x404   : > { %2428 = vmatpush1.msra.mxu1 %v2353_v50 }
 0x405   : > { %2429 = vmatprep.subr.mxu1 %v2352_v51 }
 0x406   : > { %2430 = vmatpush1.msra.mxu1 %v2351_v52 }
 0x407   : > { %2431 = vmatprep.subr.mxu1 %v2350_v53 }
 0x408   : > { %2432 = vmatpush1.msra.mxu1 %v2349_v54 }
 0x409   : > { %2433 = vmatprep.subr.mxu1 %v2348_v55 }
 0x40a   : > { %2434 = vmatpush1.msra.mxu1 %v2347_v56 }
 0x40b   : > { %2435 = vmatprep.subr.mxu1 %v2346_v57 }
 0x40c   : > { %2436 = vmatpush1.msra.mxu1 %v2345_v58 }
 0x40d   : > { %2437 = vmatprep.subr.mxu1 %v2344_v59 }
 0x40e   : > { %2438 = vmatpush1.msra.mxu1 %v2343_v60 }
 0x40f   : > { %2439 = vmatprep.subr.mxu1 %v2342_v61 }
 0x410   : > { %2440 = vmatpush1.msra.mxu1 %v2341_v62 }
 0x411   : > { %2441 = vmatprep.subr.mxu1 %v2340_v63 }
 0x412   : > { %2442 = vmatpush1.msra.mxu1 %v2339_v0 }
 0x413   : > { %2443 = vmatprep.subr.mxu1 %v2338_v1 }
 0x414   : > { %2444 = vmatpush1.msra.mxu1 %v2337_v2 }
 0x415   : > { %2445 = vmatprep.subr.mxu1 %v2400_v3 }
 0x416   : > { %2446 = vmatpush2.msra.mxu1 %v2399_v4 }
 0x417   : > { %2447 = vmatprep.subr.mxu1 %v2398_v5 }
 0x418   : > { %2448 = vmatpush2.msra.mxu1 %v2397_v6 }
 0x419   : > { %2449 = vmatprep.subr.mxu1 %v2396_v7 }
 0x41a   : > { %2450 = vmatpush2.msra.mxu1 %v2395_v8 }
 0x41b   : > { %2451 = vmatprep.subr.mxu1 %v2394_v9 }
 0x41c   : > { %2452 = vmatpush2.msra.mxu1 %v2393_v10 }
 0x41d   : > { %2453 = vmatprep.subr.mxu1 %v2392_v11 }
 0x41e   : > { %2454 = vmatpush2.msra.mxu1 %v2391_v13 }
 0x41f   : > { %2455 = vmatprep.subr.mxu1 %v2390_v14 }
 0x420   : > { %2456 = vmatpush2.msra.mxu1 %v2389_v16 }
 0x421   : > { %2457 = vmatprep.subr.mxu1 %v2388_v17 }
 0x422   : > { %2458 = vmatpush2.msra.mxu1 %v2387_v18 }
 0x423   : > { %2459 = vmatprep.subr.mxu1 %v2386_v21 }
 0x424   : > { %2460 = vmatpush2.msra.mxu1 %v2385_v22 }
 0x425   : > { %2461 = vmatprep.subr.mxu1 %v2384_v23 }
 0x426   : > { %2462 = vmatpush2.msra.mxu1 %v2383_v24 }
 0x427   : > { %2463 = vmatprep.subr.mxu1 %v2382_v26 }
 0x428   : > { %2464 = vmatpush2.msra.mxu1 %v2381_v28 }
 0x429   : > { %2465 = vmatprep.subr.mxu1 %v2380_v30 }
 0x42a   : > { %2466 = vmatpush2.msra.mxu1 %v2379_v31 }
 0x42b   : > { %2467 = vmatprep.subr.mxu1 %v2378_v33 }
 0x42c   : > { %2468 = vmatpush2.msra.mxu1 %v2377_v34 }
 0x42d   : > { %2469 = vmatprep.subr.mxu1 %v2376_v35 }
 0x42e   : > { %2470 = vmatpush2.msra.mxu1 %v2375_v36 }
 0x42f   : > { %2471 = vmatprep.subr.mxu1 %v2374_v37 }
 0x430   : > { %2472 = vmatpush2.msra.mxu1 %v2373_v38 }
 0x431   : > { %2473 = vmatprep.subr.mxu1 %v2372_v39 }
 0x432   : > { %2474 = vmatpush2.msra.mxu1 %v2371_v40 }
 0x433   : > { %2475 = vmatprep.subr.mxu1 %v2370_v32 }
 0x434   : > { %2476 = vmatpush2.msra.mxu1 %v2369_v41  ;;  %v2401_v41 = vld [vmem:[%s3809_s29] sm:$0x3] }
 0x4ad   : > { %v2770_v42 = vpop.f32.mrf.mxu1 }
 0x4ae   : > { %v2171_v43 = vcombine.high %v2770_v42, %v3207_v25  ;;  %v2178_v27 = vrot.slane %v2770_v42, %v3515_v19  ;;  %v2406_v42 = vrot.slane %v2401_v41, %v3507_v12 }
 0x4af   : > { %v2015_v44 = vpop.f32.mrf.mxu1 }
 0x4b0   : > { %v2185_v20 = vrot.slane %v2171_v43, %v3515_v19  ;;  %v2105_v48 = vcombine.high %v2015_v44, %v3207_v25  ;;  %v2112_v54 = vrot.slane %v2015_v44, %v3515_v19  ;;  %v2410_v43 = vrot.slane %v2401_v41, %v3512_v15 }
 0x4b2   : > { %v2119_v60 = vrot.slane %v2105_v48, %v3515_v19 }
 0x4b5   : > { %v2777_v45 = vpop.f32.mrf.mxu1 }
 0x4b6   : > { %v2186_v46 = vcombine.high %v2777_v45, %v3207_v25  ;;  %v2193_v47 = vrot.slane %v2777_v45, %v3515_v19 }
 0x4b7   : > { %v2096_v49 = vpop.f32.mrf.mxu1 }
 0x4b8   : > { %v2200_v50 = vrot.slane %v2186_v46, %v3515_v19  ;;  %v2201_v51 = vcombine.low %v2178_v27, %v2193_v47  ;;  %v2202_v52 = vcombine.high %v2178_v27, %v2193_v47  ;;  %v2120_v53 = vcombine.high %v2096_v49, %v3207_v25 }
 0x4b9   : > { %v2127_v55 = vrot.slane %v2096_v49, %v3515_v19 }
 0x4ba   : > { %v2209_v56 = vrot.slane %v2201_v51, %v3520_v29  ;;  %v2216_v57 = vrot.slane %v2202_v52, %v3520_v29  ;;  %v2217_v58 = vcombine.low %v2185_v20, %v2200_v50  ;;  %v2218_v59 = vcombine.high %v2185_v20, %v2200_v50 }
 0x4bb   : > { %v2134_v61 = vrot.slane %v2120_v53, %v3515_v19  ;;  %v2135_v62 = vcombine.low %v2112_v54, %v2127_v55  ;;  %v2136_v63 = vcombine.high %v2112_v54, %v2127_v55 }
 0x4bc   : > { %v2225_v0 = vrot.slane %v2217_v58, %v3520_v29  ;;  %v2232_v25 = vrot.slane %v2218_v59, %v3520_v29  ;;  %v2287_v1 = vcombine.low %v2209_v56, %v2216_v57  ;;  %v2723_v2 = vcombine.high %v2209_v56, %v2216_v57 }
 0x4bd   : > { %v2143_v3 = vrot.slane %v2135_v62, %v3520_v29  ;;  %v2150_v4 = vrot.slane %v2136_v63, %v3520_v29  ;;  %v2151_v5 = vcombine.low %v2119_v60, %v2134_v61  ;;  %v2152_v6 = vcombine.high %v2119_v60, %v2134_v61 }
 0x4be   : > { %v2303_v7 = vcombine.low %v2225_v0, %v2232_v25  ;;  %v2724_v8 = vcombine.high %v2225_v0, %v2232_v25  ;;  %v2294_v14 = vrot.slane %v2287_v1, %v3515_v19  ;;  %v2302_v16 = vrot.slane %v2723_v2, %v3515_v19 }
 0x4bf   : > { %v2159_v9 = vrot.slane %v2151_v5, %v3520_v29  ;;  %v2166_v10 = vrot.slane %v2152_v6, %v3520_v29  ;;  %v2237_v11 = vcombine.low %v2143_v3, %v2150_v4  ;;  %v2721_v13 = vcombine.high %v2143_v3, %v2150_v4 }
 0x4c0   : > { %v2310_v17 = vrot.slane %v2303_v7, %v3515_v19  ;;  %v2318_v18 = vrot.slane %v2724_v8, %v3515_v19  ;;  %v2319_v34 = vcombine.low %v2294_v14, %v2302_v16 }
 0x4c1   : > { %v2244_v21 = vrot.slane %v2237_v11, %v3515_v19  ;;  %v2252_v22 = vrot.slane %v2721_v13, %v3515_v19  ;;  %v2253_v23 = vcombine.low %v2159_v9, %v2166_v10  ;;  %v2722_v24 = vcombine.high %v2159_v9, %v2166_v10 }
 0x4c2   : > { %v2327_v31 = vcombine.low %v2310_v17, %v2318_v18  ;;  %v2326_v40 = vrot.slane %v2319_v34, %v3520_v29 }
 0x4c3   : > { %v2260_v26 = vrot.slane %v2253_v23, %v3515_v19  ;;  %v2268_v28 = vrot.slane %v2722_v24, %v3515_v19  ;;  %v2269_v30 = vcombine.low %v2244_v21, %v2252_v22 }
 0x4c4   : > { %v2334_v37 = vrot.slane %v2327_v31, %v3520_v29 }
 0x4c5   : > { %v2277_v33 = vcombine.low %v2260_v26, %v2268_v28  ;;  %v2276_v35 = vrot.slane %v2269_v30, %v3520_v29 }
 0x4c6   : > { %v2336_v32 = vcombine.high %v2326_v40, %v2334_v37  ;;  %v2335_v19 = vcombine.low %v2326_v40, %v2334_v37 }
 0x4c7   : > { %v2284_v36 = vrot.slane %v2277_v33, %v3520_v29 }
 0x4c9   : > { %v2286_v38 = vcombine.high %v2276_v35, %v2284_v36  ;;  %v2285_v39 = vcombine.low %v2276_v35, %v2284_v36 }
 0x4cb   : > { %2477 = vmatprep.mubr.f32.mxu1 %v2286_v38 }
 0x4cc   : > { %2478 = vmatmul.mubr.f32.vlgmr.msra.gmra.mxu1 %v2285_v39 }
 0x4cd   : > { %2483 = vmatprep.mubr.f32.mxu1 %v2336_v32 }
 0x4d0   : > { %2484 = vmatmul.mubr.f32.gmra.mxu1 %v2335_v19 }
 0x58c   : > { %v2479_v44 = vpop.f32.mrf.mxu1 }
 0x58d   : > { %v2480_v45 = vadd.f32 %v2479_v44, %v2406_v42 }
 0x58e   : > { %v2481_v29 = vpop.f32.mrf.mxu1 }
 0x58f   : > { %2490 = vst [vmem:[%s558_s30] sm:$0xff] %v2480_v45  ;;  %v2482_v27 = vadd.f32 %v2481_v29, %v2410_v43 }
 0x590   : > { %v2485_v46 = vpop.f32.mrf.mxu1 }
 0x591   : > { %2491 = vst [vmem:[%s558_s30 + $0x8] sm:$0xff] %v2482_v27  ;;  %v2486_v12 = vadd.f32 %v2485_v46, %v2406_v42 }
 0x592   : > { %v2487_v47 = vpop.f32.mrf.mxu1 }
 0x593   : > { %2492 = vst [vmem:[%s558_s30 + $0x10] sm:$0xff] %v2486_v12  ;;  %v2488_v15 = vadd.f32 %v2487_v47, %v2410_v43 }
 0x595   : > { %2493 = vst [vmem:[%s558_s30 + $0x18] sm:$0xff] %v2488_v15 }
 0x596   : > { %3115 = shalt.err (!%p3112_p0)
}
 0x597   : > { %s3116_s23 = scalar_lea.hbm %s3698_s11, 512  ;;  %s3120_s1 = scalar_lea.hbm %s3811_s24, 1024 }
 0x598   : > { %p3117_p11 = scmp.ne.s32.totalorder %s3698_s11, %s3116_s23  ;;  %p3121_p8 = scmp.lt.s32.totalorder %s3698_s11, %s3811_s24 }
 0x599   : > { %p3122_p12 = scmp.lt.s32.totalorder %s3120_s1, %s3116_s23 }
 0x59a   : > { %p3118_p10 = pnand %p3117_p11, %p3368_p7 }
 0x59b   : > { %p3123_p5 = por %p3122_p12, %p3121_p8 }
 0x59c   : > { %p3119_p1 = pneg %p3118_p10 }
 0x59e   : > { %p3124_p4 = pnand %p3123_p5, %p3119_p1 }
 0x5a0   : > { %3127 = shalt.err (!%p3124_p4)
}
 0x5a1   : > { %s3209_s5 = smov 256   ;;  %s3210_s28 = smov 16  }
 0x5a2   : > { %2800 = dma.vmem_to_hbm [thread:$0]  (%p3368_p7), %s3693_s22, 512, %s3698_s11, %s2495_s15, %s3209_s5, %s3209_s5, %s3210_s28  }
 0x5a3 PF: > { %s3812_s29 = sld [smem:[#allocation22_spill]] }
 0x5a4   : > { %s3813_s30 = sld [smem:[#allocation25_spill]] }
 0x5a5   : > { %s3814_s10 = sld [smem:[#allocation24_spill]] }
 0x5a9   : > { %s2526_s13 = sand.u32 1, %s3812_s29  }
 0x5aa   : > { %p3815_p2 = scmp.ne.s32.totalorder %s3813_s30, 0  ;;  %s2527_s21 = scalar_lea.sflag [#allocation6], %s2526_s13 }
 0x5ab   : > { %p3816_p3 = scmp.ge.s32.totalorder %s3814_s10, 2 }
 0x5ad   : > { %p2826_p6 = pnand %p3816_p3, %p3815_p2 }
 0x5af   : > { %p2827_p9 = pneg %p2826_p6 }
 0x5b1   : > { %3169 = dma.done.wait (%p2827_p9), %s2527_s21, 512  }
 0x5b2   : > { %3171 = vsyncadd (%p2827_p9), %s2527_s21, 4294966784  ;;  %s32_s22 = sadd.s32 1, %s3814_s10   ;;  %s3817_s16 = sld [smem:[#allocation28_spill]] }
 0x5b3   : > { %p29_p13 = scmp.ge.s32.totalorder %s32_s22, 4   ;;  %s3818_s20 = sld [smem:[#allocation23_spill]] }
 0x5b4   : > { %s3819_s21 = sld [smem:[#allocation26_spill]]  ;;  %s3820_s17 = smov %s3178_s18 }
 0x5b5   : > { %s3821_s18 = smov %s3182_s19  ;;  %31 = sbr.rel (!%p29_p13) target bundleno = 17 (0x11), region = 153 }
 0x5b8   : > { %s3822_s19 = smov %s3817_s16 }
 0x5ba   :  { %2532 = vsyncpa [#allocation5], 1 }
 0x5bb   :  { %2534 = vsyncpa [#allocation5 + $0x1], 1 }
 0x5bc   :  { %2535 = vsyncpa [#allocation8], 1 }
 0x5bd   :  { %2537 = vsyncpa [#allocation8 + $0x1], 1 }
 0x5be   :  { %2538 = vsyncpa [#allocation11], 1 }
 0x5bf   :  { %2539 = vsyncpa [#allocation14], 1 }
 0x5c0   :  { %2540 = vsyncpa [#allocation6], 1 }
 0x5c1   :  { %2542 = vsyncpa [#allocation6 + $0x1], 1 }

</bundles_post_ra>
